<compile_context>
chip_gen: v7x
topology: tpu7x:2x2x1
jax: 0.10.0
libtpu: 0.0.40
codegen_flags: <defaults>
</compile_context>

<pallas_src>
import functools

import jax
import jax.numpy as jnp
from jax import lax
from jax.experimental import pallas as pl
from jax.experimental.pallas import tpu as pltpu


def _round_up(v, m):
    return ((v + m - 1) // m) * m


def _mlp_kernel(x_ref, w1_ref, b1_ref, w2_ref, b2_ref, w3_ref, b3_ref,
                o_ref, acc_ref, *, d_total, tile_k):
    k = pl.program_id(1)
    nk = pl.num_programs(1)

    @pl.when(k == 0)
    def _():
        acc_ref[...] = jnp.zeros_like(acc_ref)

    # Layer 1 partial product over this K tile; f32 accumulation in VMEM scratch.
    # x is cast to the weight dtype here (no wrapper-side astype HBM pass).
    xa = x_ref[...].astype(w1_ref.dtype)
    w1a = w1_ref[...]
    rem = d_total % tile_k
    if rem != 0:
        # Final K tile is partial: the DMA only fills the in-bounds region and
        # the rest of the VMEM buffer is unspecified.  Zero the tail of BOTH
        # operands so 0 * 0 = 0 (masking only one side could still give NaN).
        limit = jnp.where(k == nk - 1, rem, tile_k)
        xcol = lax.broadcasted_iota(jnp.int32, xa.shape, 1)
        wrow = lax.broadcasted_iota(jnp.int32, w1a.shape, 0)
        xa = jnp.where(xcol < limit, xa, jnp.zeros_like(xa))
        w1a = jnp.where(wrow < limit, w1a, jnp.zeros_like(w1a))
    acc_ref[...] += jnp.dot(xa, w1a, preferred_element_type=jnp.float32)

    @pl.when(k == nk - 1)
    def _():
        # Layer 1 epilogue: bias + ReLU (Dropout = identity at eval).
        h1 = jnp.maximum(acc_ref[...] + b1_ref[...], 0.0)
        # Layer 2: Linear(256, 128) + ReLU (Dropout = identity at eval).
        h2 = jnp.dot(h1.astype(w2_ref.dtype), w2_ref[...],
                     preferred_element_type=jnp.float32)
        h2 = jnp.maximum(h2 + b2_ref[...], 0.0)
        # Layer 3: Linear(128, 1), computed transposed so the result lands
        # lane-dense as a (1, batch_tile) row: (1,128) @ (bt,128)^T -> (1, bt).
        out_row = lax.dot_general(
            w3_ref[...], h2.astype(w3_ref.dtype),
            dimension_numbers=(((1,), (1,)), ((), ())),
            preferred_element_type=jnp.float32,
        )
        o_ref[...] = (out_row + b3_ref[0]).astype(o_ref.dtype)


def tcga_model_forward(x, params, *, batch_tile=512, k_tile=2048):
    """Fused 3-layer MLP forward. x: [B, input_dim] -> [B, 1] f32.

    Weights are used in their stored (at-rest) dtype -- keep them in bf16 for
    the HBM-bound regime; x is cast to that dtype inside the kernel.
    Accumulation, bias-add and ReLU are always f32.
    """
    w1, b1, w2, b2, w3, b3 = params
    B, D = x.shape
    H1 = w1.shape[1]   # 256
    H2 = w2.shape[1]   # 128

    # ---- Batch tile: multiple of 128; keep >= 2 parallel grid steps when B
    # allows so the batch axis can shard across v7x's two TensorCores. --------
    bt = max(128, (int(batch_tile) // 128) * 128)
    if B > 128:
        bt = min(bt, _round_up(pl.cdiv(B, 2), 128))
    bt = min(bt, _round_up(B, 128))
    num_b = pl.cdiv(B, bt)
    padded_B = num_b * bt          # pads only the tiny output, never x

    # ---- K tile for the layer-1 reduction: bounds VMEM independent of D. ----
    if D <= k_tile:
        tk = D                     # single K step; block dim == full array dim
    else:
        tk = max(128, (int(k_tile) // 128) * 128)
    num_k = pl.cdiv(D, tk)

    kernel = functools.partial(_mlp_kernel, d_total=D, tile_k=tk)

    in_specs = [
        pl.BlockSpec((bt, tk), lambda i, k: (i, k)),         # x   [bt, tk]
        pl.BlockSpec((tk, H1), lambda i, k: (k, 0)),         # w1  [tk, 256]
        pl.BlockSpec((1, H1), lambda i, k: (0, 0)),          # b1  [1, 256]
        pl.BlockSpec((H1, H2), lambda i, k: (0, 0)),         # w2  [256, 128]
        pl.BlockSpec((1, H2), lambda i, k: (0, 0)),          # b2  [1, 128]
        pl.BlockSpec((1, H2), lambda i, k: (0, 0)),          # w3  [1, 128]
        pl.BlockSpec(memory_space=pltpu.MemorySpace.SMEM),   # b3  [1] scalar
    ]
    # Lane-dense output: one (1, batch_tile) row per batch tile, resident
    # across the K axis and written once at the final K step.
    out_specs = pl.BlockSpec((1, bt), lambda i, k: (0, i))

    flops = 2 * padded_B * (D * H1 + H1 * H2 + H2)
    bytes_accessed = (
        B * D * x.dtype.itemsize                 # x read once
        + num_b * D * H1 * w1.dtype.itemsize     # w1 re-read per batch tile
        + H1 * H2 * w2.dtype.itemsize
        + (H1 + H2 + H2 + 1) * 4
        + padded_B * 4)
    cost = pl.CostEstimate(flops=flops, transcendentals=0,
                           bytes_accessed=bytes_accessed)

    # Scoped VMEM sized from the actual tile footprint (double-buffered inputs
    # + f32 accumulator scratch), with headroom.
    vmem_bytes = (
        2 * bt * tk * x.dtype.itemsize           # x blocks (double-buffered)
        + 2 * tk * H1 * w1.dtype.itemsize        # w1 blocks (double-buffered)
        + 2 * H1 * H2 * w2.dtype.itemsize        # w2
        + 2 * (H1 + 2 * H2) * 4                  # b1, b2, w3 (tiny)
        + 2 * bt * 4                             # output row
        + bt * H1 * 4)                           # h1 accumulator scratch
    vmem_limit = min(int(vmem_bytes * 1.5) + (2 << 20), 64 * 1024 * 1024)

    out_row = pl.pallas_call(
        kernel,
        out_shape=jax.ShapeDtypeStruct((1, padded_B), jnp.float32),
        grid_spec=pltpu.PrefetchScalarGridSpec(
            num_scalar_prefetch=0,
            grid=(num_b, num_k),                 # reduction axis last
            in_specs=in_specs,
            out_specs=out_specs,
            scratch_shapes=[pltpu.VMEM((bt, H1), jnp.float32)],
        ),
        compiler_params=pltpu.CompilerParams(
            dimension_semantics=("parallel", "arbitrary"),
            vmem_limit_bytes=vmem_limit,
        ),
        cost_estimate=cost,
    )(x, w1, b1, w2, b2, w3, b3)

    # (1, padded_B) row-of-batch -> (B, 1) column, dropping padded lanes
    # (these are the only lanes a partial batch block can pollute).
    return out_row.reshape(padded_B, 1)[:B]


def init_params(key, input_dim, weight_dtype=jnp.bfloat16):
    """Init matching nn.Linear's U(-1/sqrt(fan_in), 1/sqrt(fan_in)).

    Weights are materialized once in `weight_dtype` (bf16 recommended: the
    kernel is HBM-bound); biases stay f32.  w1: [input_dim, 256], w2: [256,128]
    stored [in, out]; w3: [1, 128] in PyTorch [out, in] layout; b3: [1].
    """
    k1w, k1b, k2w, k2b, k3w, k3b = jax.random.split(key, 6)

    def u(k, shape, fan_in):
        bound = 1.0 / (float(fan_in) ** 0.5)
        return jax.random.uniform(k, shape, jnp.float32, -bound, bound)

    w1 = u(k1w, (input_dim, 256), input_dim).astype(weight_dtype)
    b1 = u(k1b, (1, 256), input_dim)
    w2 = u(k2w, (256, 128), 256).astype(weight_dtype)
    b2 = u(k2b, (1, 128), 256)
    w3 = u(k3w, (1, 128), 128).astype(weight_dtype)
    b3 = u(k3b, (1,), 128)
    return (w1, b1, w2, b2, w3, b3)


def reference_forward(x, params):
    w1, b1, w2, b2, w3, b3 = params
    w1 = w1.astype(jnp.float32); w2 = w2.astype(jnp.float32); w3 = w3.astype(jnp.float32)
    h1 = jnp.maximum(x @ w1 + b1, 0.0)
    h2 = jnp.maximum(h1 @ w2 + b2, 0.0)
    return h2 @ w3.T + b3            # w3 is (1, 128) PyTorch layout


if __name__ == "__main__":
    key = jax.random.PRNGKey(0)
    k_x, k_p = jax.random.split(key)

    INPUT_DIM = 600   # deliberately not a multiple of the K tile
    B = 256

    x = jax.random.normal(k_x, (B, INPUT_DIM), dtype=jnp.float32)

    # f32 at-rest weights for bit-level parity with the reference.
    params_f32 = init_params(k_p, INPUT_DIM, weight_dtype=jnp.float32)
    ref = reference_forward(x, params_f32)

    # 1) f32 path, single K step (k_tile >= D).
    out = jax.block_until_ready(tcga_model_forward(x, params_f32))
    assert out.shape == (B, 1)
    assert jnp.allclose(out, ref, atol=2e-3, rtol=2e-3), "f32 kernel mismatch"

    # 2) Multi-step K reduction with a partial (masked) final K tile.
    out_k = jax.block_until_ready(tcga_model_forward(x, params_f32, k_tile=256))
    assert jnp.allclose(out_k, ref, atol=2e-3, rtol=2e-3), "K-tiled kernel mismatch"

    # 3) Batch smaller than the tile: partial batch block, no wrapper-side pad.
    x_small = x[:8]
    out_small = jax.block_until_ready(tcga_model_forward(x_small, params_f32))
    assert out_small.shape == (8, 1)
    assert jnp.allclose(out_small, ref[:8], atol=2e-3, rtol=2e-3), "partial-batch mismatch"

    # 4) bf16 at-rest weights (one-time cast, outside the hot path); f32
    #    accumulate / bias / ReLU inside the kernel.
    w1, b1, w2, b2, w3, b3 = params_f32
    params_bf16 = (w1.astype(jnp.bfloat16), b1, w2.astype(jnp.bfloat16), b2,
                   w3.astype(jnp.bfloat16), b3)
    out_bf16 = jax.block_until_ready(tcga_model_forward(x, params_bf16))
    assert out_bf16.shape == (B, 1)
    assert jnp.allclose(out_bf16, ref, atol=5e-2, rtol=5e-2), "bf16 kernel mismatch"

    print("KERNEL_OK")
</pallas_src>

<mosaic_0001>
module attributes {stable_mosaic.version = 11 : i64} {
  func.func @_mlp_kernel(%arg0: i32, %arg1: i32, %arg2: memref<128x600xf32, #tpu.memory_space<vmem>>, %arg3: memref<600x256xf32, #tpu.memory_space<vmem>>, %arg4: memref<1x256xf32, #tpu.memory_space<vmem>>, %arg5: memref<256x128xf32, #tpu.memory_space<vmem>>, %arg6: memref<1x128xf32, #tpu.memory_space<vmem>>, %arg7: memref<1x128xf32, #tpu.memory_space<vmem>>, %arg8: memref<1xf32, #tpu.memory_space<smem>>, %arg9: memref<1x128xf32, #tpu.memory_space<vmem>>, %arg10: memref<128x256xf32, #tpu.memory_space<vmem>>) attributes {dimension_semantics = [#tpu.dimension_semantics<parallel>, #tpu.dimension_semantics<arbitrary>], iteration_bounds = array<i64: 2, 1>, scalar_prefetch = 0 : i64, scratch_operands = 1 : i64, tpu.core_type = #tpu.core_type<tc>, window_params = [{transform_indices = @transform_0, window_bounds = array<i64: 128, 600>}, {transform_indices = @transform_1, window_bounds = array<i64: 600, 256>}, {pipeline_mode = #tpu.pipeline_mode<synchronous>, transform_indices = @transform_2, window_bounds = array<i64: 1, 256>}, {pipeline_mode = #tpu.pipeline_mode<synchronous>, transform_indices = @transform_3, window_bounds = array<i64: 256, 128>}, {pipeline_mode = #tpu.pipeline_mode<synchronous>, transform_indices = @transform_4, window_bounds = array<i64: 1, 128>}, {pipeline_mode = #tpu.pipeline_mode<synchronous>, transform_indices = @transform_5, window_bounds = array<i64: 1, 128>}, {transform_indices = @transform_6, window_bounds = array<i64: 1>}, {transform_indices = @transform_7, window_bounds = array<i64: 1, 128>}]} {
    %c0_i32 = arith.constant 0 : i32
    %0 = arith.cmpi eq, %arg1, %c0_i32 : i32
    %1 = arith.extui %0 : i1 to i32
    %c0_i32_0 = arith.constant 0 : i32
    %2 = arith.cmpi ne, %1, %c0_i32_0 : i32
    scf.if %2 {
      %cst_10 = arith.constant 0.000000e+00 : f32
      %12 = vector.broadcast %cst_10 : f32 to vector<128x256xf32>
      %c0_11 = arith.constant 0 : index
      %c0_12 = arith.constant 0 : index
      %13 = vector.load %arg10[%c0_11, %c0_12] : memref<128x256xf32, #tpu.memory_space<vmem>>, vector<128x256xf32>
      tpu.vector_store %arg10[%c0_11, %c0_12], %12 {strides = array<i32>} : memref<128x256xf32, #tpu.memory_space<vmem>>, vector<128x256xf32>,
    } else {
    }
    %c0 = arith.constant 0 : index
    %c0_1 = arith.constant 0 : index
    %3 = vector.load %arg2[%c0, %c0_1] : memref<128x600xf32, #tpu.memory_space<vmem>>, vector<128x600xf32>
    %c0_2 = arith.constant 0 : index
    %c0_3 = arith.constant 0 : index
    %4 = vector.load %arg3[%c0_2, %c0_3] : memref<600x256xf32, #tpu.memory_space<vmem>>, vector<600x256xf32>
    %c0_4 = arith.constant 0 : index
    %c0_5 = arith.constant 0 : index
    %5 = vector.load %arg10[%c0_4, %c0_5] : memref<128x256xf32, #tpu.memory_space<vmem>>, vector<128x256xf32>
    %cst = arith.constant dense<0.000000e+00> : vector<128x256xf32>
    %6 = tpu.matmul %3, %4, %cst {dimension_numbers = #tpu.dot_dimension_numbers<[1], [0], [0], [1], [0, 0, 1, 1], [], []>} : vector<128x600xf32>, vector<600x256xf32>, vector<128x256xf32> -> vector<128x256xf32>
    %7 = arith.addf %5, %6 : vector<128x256xf32>
    %c0_6 = arith.constant 0 : index
    %c0_7 = arith.constant 0 : index
    %8 = vector.load %arg10[%c0_6, %c0_7] : memref<128x256xf32, #tpu.memory_space<vmem>>, vector<128x256xf32>
    tpu.vector_store %arg10[%c0_6, %c0_7], %7 {strides = array<i32>} : memref<128x256xf32, #tpu.memory_space<vmem>>, vector<128x256xf32>,
    %c0_i32_8 = arith.constant 0 : i32
    %9 = arith.cmpi eq, %arg1, %c0_i32_8 : i32
    %10 = arith.extui %9 : i1 to i32
    %c0_i32_9 = arith.constant 0 : i32
    %11 = arith.cmpi ne, %10, %c0_i32_9 : i32
    scf.if %11 {
      %c0_10 = arith.constant 0 : index
      %c0_11 = arith.constant 0 : index
      %12 = vector.load %arg10[%c0_10, %c0_11] : memref<128x256xf32, #tpu.memory_space<vmem>>, vector<128x256xf32>
      %c0_12 = arith.constant 0 : index
      %c0_13 = arith.constant 0 : index
      %13 = vector.load %arg4[%c0_12, %c0_13] : memref<1x256xf32, #tpu.memory_space<vmem>>, vector<1x256xf32>
      %14 = vector.broadcast %13 : vector<1x256xf32> to vector<128x256xf32>
      %15 = arith.addf %12, %14 : vector<128x256xf32>
      %cst_14 = arith.constant 0.000000e+00 : f32
      %16 = vector.broadcast %cst_14 : f32 to vector<128x256xf32>
      %17 = arith.maximumf %15, %16 : vector<128x256xf32>
      %c0_15 = arith.constant 0 : index
      %c0_16 = arith.constant 0 : index
      %18 = vector.load %arg5[%c0_15, %c0_16] : memref<256x128xf32, #tpu.memory_space<vmem>>, vector<256x128xf32>
      %cst_17 = arith.constant dense<0.000000e+00> : vector<128x128xf32>
      %19 = tpu.matmul %17, %18, %cst_17 {dimension_numbers = #tpu.dot_dimension_numbers<[1], [0], [0], [1], [0, 0, 1, 1], [], []>} : vector<128x256xf32>, vector<256x128xf32>, vector<128x128xf32> -> vector<128x128xf32>
      %c0_18 = arith.constant 0 : index
      %c0_19 = arith.constant 0 : index
      %20 = vector.load %arg6[%c0_18, %c0_19] : memref<1x128xf32, #tpu.memory_space<vmem>>, vector<1x128xf32>
      %21 = vector.broadcast %20 : vector<1x128xf32> to vector<128x128xf32>
      %22 = arith.addf %19, %21 : vector<128x128xf32>
      %cst_20 = arith.constant 0.000000e+00 : f32
      %23 = vector.broadcast %cst_20 : f32 to vector<128x128xf32>
      %24 = arith.maximumf %22, %23 : vector<128x128xf32>
      %c0_21 = arith.constant 0 : index
      %c0_22 = arith.constant 0 : index
      %25 = vector.load %arg7[%c0_21, %c0_22] : memref<1x128xf32, #tpu.memory_space<vmem>>, vector<1x128xf32>
      %cst_23 = arith.constant dense<0.000000e+00> : vector<1x128xf32>
      %26 = tpu.matmul %25, %24, %cst_23 {dimension_numbers = #tpu.dot_dimension_numbers<[1], [1], [0], [0], [0, 0, 1, 0], [], []>} : vector<1x128xf32>, vector<128x128xf32>, vector<1x128xf32> -> vector<1x128xf32>
      %c0_24 = arith.constant 0 : index
      %27 = memref.load %arg8[%c0_24] : memref<1xf32, #tpu.memory_space<smem>>
      %28 = vector.broadcast %27 : f32 to vector<1x128xf32>
      %29 = arith.addf %26, %28 : vector<1x128xf32>
      %c0_25 = arith.constant 0 : index
      %c0_26 = arith.constant 0 : index
      %30 = vector.load %arg9[%c0_25, %c0_26] : memref<1x128xf32, #tpu.memory_space<vmem>>, vector<1x128xf32>
      tpu.vector_store %arg9[%c0_25, %c0_26], %29 {strides = array<i32>} : memref<1x128xf32, #tpu.memory_space<vmem>>, vector<1x128xf32>,
    } else {
    }
    return
  }
  func.func @transform_0(%arg0: i32, %arg1: i32) -> (i32, i32) {
    %c0_i32 = arith.constant 0 : i32
    return %arg0, %arg1 : i32, i32
  }
  func.func @transform_1(%arg0: i32, %arg1: i32) -> (i32, i32) {
    %c0_i32 = arith.constant 0 : i32
    %c0_i32_0 = arith.constant 0 : i32
    return %arg1, %c0_i32 : i32, i32
  }
  func.func @transform_2(%arg0: i32, %arg1: i32) -> (i32, i32) {
    %c0_i32 = arith.constant 0 : i32
    %c0_i32_0 = arith.constant 0 : i32
    %c0_i32_1 = arith.constant 0 : i32
    return %c0_i32, %c0_i32_0 : i32, i32
  }
  func.func @transform_3(%arg0: i32, %arg1: i32) -> (i32, i32) {
    %c0_i32 = arith.constant 0 : i32
    %c0_i32_0 = arith.constant 0 : i32
    %c0_i32_1 = arith.constant 0 : i32
    return %c0_i32, %c0_i32_0 : i32, i32
  }
  func.func @transform_4(%arg0: i32, %arg1: i32) -> (i32, i32) {
    %c0_i32 = arith.constant 0 : i32
    %c0_i32_0 = arith.constant 0 : i32
    %c0_i32_1 = arith.constant 0 : i32
    return %c0_i32, %c0_i32_0 : i32, i32
  }
  func.func @transform_5(%arg0: i32, %arg1: i32) -> (i32, i32) {
    %c0_i32 = arith.constant 0 : i32
    %c0_i32_0 = arith.constant 0 : i32
    %c0_i32_1 = arith.constant 0 : i32
    return %c0_i32, %c0_i32_0 : i32, i32
  }
  func.func @transform_6(%arg0: i32, %arg1: i32) -> i32 {
    %c0_i32 = arith.constant 0 : i32
    %c0_i32_0 = arith.constant 0 : i32
    return %c0_i32 : i32
  }
  func.func @transform_7(%arg0: i32, %arg1: i32) -> (i32, i32) {
    %c0_i32 = arith.constant 0 : i32
    %c0_i32_0 = arith.constant 0 : i32
    return %c0_i32, %arg0 : i32, i32
  }
}

</mosaic_0001>

<bundles_post_ra>
// kernel: tpu_custom_call.1
= control target key start
LH: loop header
LB: loop body
LE: loop exit
PB: predicated region body
PF: predicated region fallthrough
CT: control target
= control target key end

     0   :  { %s3244_s0 = inlined_call_operand.vmem [shape: f32[256,600], index: 0, kind: input, shape index: {}]   ;;  %s3245_s1 = inlined_call_operand.vmem [shape: f32[600,256], index: 1, kind: input, shape index: {}]   ;;  %s3246_s2 = inlined_call_operand.vmem [shape: f32[1,256], index: 2, kind: input, shape index: {}]   ;;  %s3247_s3 = inlined_call_operand.vmem [shape: f32[256,128], index: 3, kind: input, shape index: {}]   ;;  %s3248_s4 = inlined_call_operand.vmem [shape: f32[1,128], index: 4, kind: input, shape index: {}]   ;;  %s3249_s5 = inlined_call_operand.vmem [shape: f32[1,128], index: 5, kind: input, shape index: {}]   ;;  %s3250_s6 = inlined_call_operand.<no memory space> [shape: f32[1], index: 6, kind: input, shape index: {}]   ;;  %s3251_s7 = inlined_call_operand.hbm [shape: f32[1,256], index: 7, kind: output, shape index: {}]  }
   0x1   :  { %12 = sst [smem:[#allocation3]] %s3250_s6 }
   0x2   :  { %13 = vsyncpa [#allocation5], 0 }
   0x3   :  { %15 = vsyncpa [#allocation5 + $0x1], 0  ;;  %s2325_s26 = smov 0   ;;  %s2327_s27 = smov 0  }
   0x4   :  { %s2329_s28 = smov 0   ;;  %s2331_s29 = smov 0  }
   0x5   :  { %s2333_s30 = smov 0   ;;  %s2335_s8 = smov 0  }
   0x6 LB: > { %s1711_s6 = sadd.s32 4294967295, %s2276_s8   ;;  %s1712_s9 = sadd.s32 4294967294, %s2276_s8   ;;  %s2276_s8 = sphi %s2335_s8, %s21_s8   ;;  %s2272_s30 = sphi %s2333_s30, %s3258_s30   ;;  %s2268_s29 = sphi %s2331_s29, %s3257_s29   ;;  %s2264_s28 = sphi %s2329_s28, %s3256_s28   ;;  %s2260_s27 = sphi %s2327_s27, %s3255_s27   ;;  %s2256_s26 = sphi %s2325_s26, %s3254_s26  }
   0x7   : > { %s33_s10 = sadd.s32 1, %s2272_s30  ;;  %s199_s11 = sadd.s32 1, %s2264_s28 }
   0x8   : > { %p35_p0 = scmp.ge.s32.totalorder %s33_s10, 2  ;;  %p209_p1 = scmp.ne.s32.totalorder %s2264_s28, %s2260_s27 }
   0x9   : > { %p210_p2 = scmp.eq.s32.totalorder %s1711_s6, 1  ;;  %p215_p3 = scmp.ne.s32.totalorder %s2260_s27, %s2256_s26 }
   0xa   : > { %s3260_s10 = smov (%p35_p0, %s33_s10), 0  ;;  %p216_p5 = scmp.eq.s32.totalorder %s1712_s9, 1 }
   0xb   : > { %p2365_p4 = por %p210_p2, %p209_p1  ;;  %s196_s13 = ssub.s32 %s2272_s30, %s3260_s10 }
   0xc   : > { %p1716_p6 = scmp.ge.s32.totalorder %s2276_s8, 1  ;;  %p197_p7 = scmp.eq.s32.totalorder %s196_s13, 0 }
   0xd   : > { %p2372_p8 = por %p216_p5, %p215_p3  ;;  %p274_p9 = scmp.lt.s32.totalorder %s2276_s8, 3 }
   0xe   : > { %s2378_s15 = scalar_select %p197_p7, %s2264_s28, %s199_s11  }
   0xf   : > { %p275_p10 = pnand %p1716_p6, %p274_p9 }
  0x10   : > { %v452_v0 = vld [vmem:[%s3245_s1 + $0x8] sm:$0xff] (!%p275_p10)  ;;  %v454_v1 = vld [vmem:[%s3245_s1 + $0x18] sm:$0xff] (!%p275_p10)  ;;  %v451_v2 = vld [vmem:[%s3245_s1] sm:$0xff] (!%p275_p10)  ;;  %v2278_v7 = vmov (!%p275_p10), 0.0   ;;  %s2412_s22 = sshll.u32 (!%p275_p10), %s2268_s29, 4  ;;  %vm633_vm0 = vcmask (!%p275_p10), 719872  }
  0x11   : > { %278 = sbr.rel (%p275_p10) target bundleno = 883 (0x373), region = 48  ;;  %v1871_v3 = vpack.c.bf16 (!%p275_p10), %v454_v1, %v452_v0  ;;  %v453_v4 = vld [vmem:[%s3245_s1 + $0x10] sm:$0xff] (!%p275_p10)  ;;  %v456_v5 = vld [vmem:[%s3245_s1 + $0x28] sm:$0xff] (!%p275_p10)  ;;  %v458_v6 = vld [vmem:[%s3245_s1 + $0x38] sm:$0xff] (!%p275_p10)  ;;  %1068 = vmatprep.mubr.f32.mxu1 (!%p275_p10), %v2278_v7  ;;  %p318_p11 = scmp.lt.s32.totalorder (!%p275_p10), %s2412_s22, 31  ;;  %vm2280_vm1 = vmmov (!%p275_p10), 0  }
  0x12   : > { %v1873_v8 = vpack.c.bf16 (!%p275_p10), %v453_v4, %v451_v2  ;;  %v1875_v9 = vpack.c.bf16 (!%p275_p10), %v458_v6, %v456_v5  ;;  %v455_v10 = vld [vmem:[%s3245_s1 + $0x20] sm:$0xff] (!%p275_p10)  ;;  %v457_v11 = vld [vmem:[%s3245_s1 + $0x30] sm:$0xff] (!%p275_p10)  ;;  %v460_v12 = vld [vmem:[%s3245_s1 + $0x48] sm:$0xff] (!%p275_p10)  ;;  %s1541_s24 = sld [smem:[#allocation3]] (!%p275_p10)  ;;  %s2281_s17 = smov (!%p275_p10), [#allocation4]  }
  0x13   : > { %1872 = vmatprep.subr.bf16.mxu0 (!%p275_p10), %v1871_v3  ;;  %v462_v13 = vld [vmem:[%s3245_s1 + $0x58] sm:$0xff] (!%p275_p10)  ;;  %v1877_v14 = vpack.c.bf16 (!%p275_p10), %v457_v11, %v455_v10  ;;  %v459_v16 = vld [vmem:[%s3245_s1 + $0x40] sm:$0xff] (!%p275_p10)  ;;  %v461_v17 = vld [vmem:[%s3245_s1 + $0x50] sm:$0xff] (!%p275_p10)  ;;  %s2202_s18 = sshll.u32 (!%p275_p10), %s2281_s17, 4  ;;  %s2203_s18 = int_to_ptr.vmem [resolvable:$false] %s2202_s18 }
  0x14   : > { %1874 = vmatpush1.bf16.msra.mxu0 (!%p275_p10), %v1873_v8  ;;  %v1879_v15 = vpack.c.bf16 (!%p275_p10), %v462_v13, %v460_v12  ;;  %v464_v18 = vld [vmem:[%s3245_s1 + $0x68] sm:$0xff] (!%p275_p10)  ;;  %v466_v19 = vld [vmem:[%s3245_s1 + $0x78] sm:$0xff] (!%p275_p10)  ;;  %v1881_v20 = vpack.c.bf16 (!%p275_p10), %v461_v17, %v459_v16  ;;  %v463_v22 = vld [vmem:[%s3245_s1 + $0x60] sm:$0xff] (!%p275_p10)  ;;  %s2204_s20 = scalar_lea.vmem (!%p275_p10), %s2203_s18, 32 }
  0x15   : > { %1876 = vmatprep.subr.bf16.mxu0 (!%p275_p10), %v1875_v9  ;;  %v1883_v21 = vpack.c.bf16 (!%p275_p10), %v466_v19, %v464_v18  ;;  %v465_v23 = vld [vmem:[%s3245_s1 + $0x70] sm:$0xff] (!%p275_p10)  ;;  %v468_v24 = vld [vmem:[%s3245_s1 + $0x88] sm:$0xff] (!%p275_p10)  ;;  %v470_v25 = vld [vmem:[%s3245_s1 + $0x98] sm:$0xff] (!%p275_p10) }
  0x16   : > { %v1885_v26 = vpack.c.bf16 (!%p275_p10), %v465_v23, %v463_v22  ;;  %v1887_v27 = vpack.c.bf16 (!%p275_p10), %v470_v25, %v468_v24  ;;  %v467_v28 = vld [vmem:[%s3245_s1 + $0x80] sm:$0xff] (!%p275_p10)  ;;  %v469_v29 = vld [vmem:[%s3245_s1 + $0x90] sm:$0xff] (!%p275_p10)  ;;  %v472_v30 = vld [vmem:[%s3245_s1 + $0xa8] sm:$0xff] (!%p275_p10) }
  0x17   : > { %v474_v31 = vld [vmem:[%s3245_s1 + $0xb8] sm:$0xff] (!%p275_p10)  ;;  %v1889_v32 = vpack.c.bf16 (!%p275_p10), %v469_v29, %v467_v28  ;;  %v471_v34 = vld [vmem:[%s3245_s1 + $0xa0] sm:$0xff] (!%p275_p10)  ;;  %v473_v35 = vld [vmem:[%s3245_s1 + $0xb0] sm:$0xff] (!%p275_p10) }
  0x18   : > { %1878 = vmatpush1.bf16.msra.mxu0 %v1877_v14  ;;  %s319_s25 = scalar_select %p318_p11, %s2412_s22, 31  ;;  %v1891_v33 = vpack.c.bf16 %v474_v31, %v472_v30  ;;  %v476_v36 = vld [vmem:[%s3245_s1 + $0xc8] sm:$0xff]  ;;  %v478_v37 = vld [vmem:[%s3245_s1 + $0xd8] sm:$0xff]  ;;  %v1893_v38 = vpack.c.bf16 %v473_v35, %v471_v34  ;;  %v475_v40 = vld [vmem:[%s3245_s1 + $0xc0] sm:$0xff] }
  0x19   : > { %1880 = vmatprep.subr.bf16.mxu0 %v1879_v15  ;;  %v1895_v39 = vpack.c.bf16 %v478_v37, %v476_v36  ;;  %v477_v41 = vld [vmem:[%s3245_s1 + $0xd0] sm:$0xff]  ;;  %v480_v43 = vld [vmem:[%s3245_s1 + $0xe8] sm:$0xff]  ;;  %v482_v44 = vld [vmem:[%s3245_s1 + $0xf8] sm:$0xff] }
  0x1a   : > { %s2139_s19 = smul.u32 40, %s319_s25  ;;  %v1897_v45 = vpack.c.bf16 %v477_v41, %v475_v40  ;;  %v1899_v46 = vpack.c.bf16 %v482_v44, %v480_v43  ;;  %v479_v47 = vld [vmem:[%s3245_s1 + $0xe0] sm:$0xff]  ;;  %v481_v48 = vld [vmem:[%s3245_s1 + $0xf0] sm:$0xff]  ;;  %v484_v49 = vld [vmem:[%s3245_s1 + $0x108] sm:$0xff]  ;;  %s3197_s25 = scalar_lea.hbm %s3251_s7, %s2412_s22 }
  0x1b   : > { %v486_v50 = vld [vmem:[%s3245_s1 + $0x118] sm:$0xff]  ;;  %v1901_v51 = vpack.c.bf16 %v481_v48, %v479_v47  ;;  %v483_v53 = vld [vmem:[%s3245_s1 + $0x100] sm:$0xff]  ;;  %v485_v54 = vld [vmem:[%s3245_s1 + $0x110] sm:$0xff] }
  0x1c   : > { %1882 = vmatpush1.bf16.msra.mxu0 %v1881_v20  ;;  %s2467_s16 = scalar_lea.vmem %s3244_s0, %s2139_s19  ;;  %v1903_v52 = vpack.c.bf16 %v486_v50, %v484_v49  ;;  %v488_v55 = vld [vmem:[%s3245_s1 + $0x128] sm:$0xff]  ;;  %v490_v56 = vld [vmem:[%s3245_s1 + $0x138] sm:$0xff]  ;;  %v1905_v57 = vpack.c.bf16 %v485_v54, %v483_v53  ;;  %v487_v59 = vld [vmem:[%s3245_s1 + $0x120] sm:$0xff]  ;;  %s314_s19 = sand.u32 1, %s2260_s27  }
  0x1d   : > { %1884 = vmatprep.subr.bf16.mxu0 %v1883_v21  ;;  %v372_v42 = vld [vmem:[%s2467_s16 + $0x8] sm:$0xff]  ;;  %v1907_v58 = vpack.c.bf16 %v490_v56, %v488_v55  ;;  %v489_v60 = vld [vmem:[%s3245_s1 + $0x130] sm:$0xff]  ;;  %v494_v62 = vld [vmem:[%s3245_s1 + $0x158] sm:$0xff]  ;;  %s315_s6 = scalar_lea.vmem [#allocation4], %s314_s19  ;;  %s1615_s13 = scalar_lea.sflag [#allocation5], %s314_s19 }
  0x1e   : > { %746 = vmatprep.mubr.f32.mxu0 %v372_v42  ;;  %v492_v61 = vld [vmem:[%s3245_s1 + $0x148] sm:$0xff]  ;;  %v1909_v63 = vpack.c.bf16 %v489_v60, %v487_v59  ;;  %v491_v1 = vld [vmem:[%s3245_s1 + $0x140] sm:$0xff]  ;;  %v493_v2 = vld [vmem:[%s3245_s1 + $0x150] sm:$0xff]  ;;  %s1627_s9 = sshll.u32 %s315_s6, 4  ;;  %s3199_s9 = int_to_ptr.vmem [resolvable:$true] %s1627_s9 }
  0x1f   : > { %v1911_v0 = vpack.c.bf16 %v494_v62, %v492_v61  ;;  %v496_v3 = vld [vmem:[%s3245_s1 + $0x168] sm:$0xff]  ;;  %v498_v4 = vld [vmem:[%s3245_s1 + $0x178] sm:$0xff]  ;;  %v1913_v5 = vpack.c.bf16 %v493_v2, %v491_v1  ;;  %v495_v8 = vld [vmem:[%s3245_s1 + $0x160] sm:$0xff]  ;;  %p2205_p1 = scmp.lt.s32.totalorder %s3199_s9, %s2203_s18 }
  0x20   : > { %1886 = vmatpush1.bf16.msra.mxu0 %v1885_v26  ;;  %v1915_v6 = vpack.c.bf16 %v498_v4, %v496_v3  ;;  %v497_v9 = vld [vmem:[%s3245_s1 + $0x170] sm:$0xff]  ;;  %v500_v10 = vld [vmem:[%s3245_s1 + $0x188] sm:$0xff]  ;;  %v502_v11 = vld [vmem:[%s3245_s1 + $0x198] sm:$0xff] }
  0x21   : > { %1888 = vmatprep.subr.bf16.mxu0 %v1887_v27  ;;  %v580_v12 = vld [vmem:[%s3245_s1 + $0x408] sm:$0xff]  ;;  %v582_v13 = vld [vmem:[%s3245_s1 + $0x418] sm:$0xff]  ;;  %v1917_v14 = vpack.c.bf16 %v497_v9, %v495_v8  ;;  %v579_v16 = vld [vmem:[%s3245_s1 + $0x400] sm:$0xff]  ;;  %v1919_v18 = vpack.c.bf16 %v502_v11, %v500_v10 }
  0x22   : > { %v1999_v15 = vpack.c.bf16 %v582_v13, %v580_v12  ;;  %v581_v17 = vld [vmem:[%s3245_s1 + $0x410] sm:$0xff]  ;;  %v499_v19 = vld [vmem:[%s3245_s1 + $0x180] sm:$0xff]  ;;  %v504_v22 = vld [vmem:[%s3245_s1 + $0x1a8] sm:$0xff] }
  0x23   : > { %v501_v20 = vld [vmem:[%s3245_s1 + $0x190] sm:$0xff]  ;;  %v2001_v21 = vpack.c.bf16 %v581_v17, %v579_v16  ;;  %v506_v23 = vld [vmem:[%s3245_s1 + $0x1b8] sm:$0xff]  ;;  %v584_v24 = vld [vmem:[%s3245_s1 + $0x428] sm:$0xff] }
  0x24   : > { %1890 = vmatpush1.bf16.msra.mxu0 %v1889_v32  ;;  %2000 = vmatprep.subr.bf16.mxu1 %v1999_v15  ;;  %v586_v25 = vld [vmem:[%s3245_s1 + $0x438] sm:$0xff]  ;;  %v583_v26 = vld [vmem:[%s3245_s1 + $0x420] sm:$0xff]  ;;  %v585_v27 = vld [vmem:[%s3245_s1 + $0x430] sm:$0xff]  ;;  %v1921_v28 = vpack.c.bf16 %v501_v20, %v499_v19  ;;  %v1923_v32 = vpack.c.bf16 %v506_v23, %v504_v22 }
  0x25   : > { %1892 = vmatprep.subr.bf16.mxu0 %v1891_v33  ;;  %2002 = vmatpush1.bf16.msra.mxu1 %v2001_v21  ;;  %v503_v29 = vld [vmem:[%s3245_s1 + $0x1a0] sm:$0xff]  ;;  %v2003_v30 = vpack.c.bf16 %v586_v25, %v584_v24  ;;  %v2005_v31 = vpack.c.bf16 %v585_v27, %v583_v26  ;;  %v505_v33 = vld [vmem:[%s3245_s1 + $0x1b0] sm:$0xff]  ;;  %v508_v34 = vld [vmem:[%s3245_s1 + $0x1c8] sm:$0xff] }
  0x26   : > { %v510_v35 = vld [vmem:[%s3245_s1 + $0x1d8] sm:$0xff]  ;;  %v588_v36 = vld [vmem:[%s3245_s1 + $0x448] sm:$0xff]  ;;  %v589_v40 = vld [vmem:[%s3245_s1 + $0x450] sm:$0xff]  ;;  %v1925_v41 = vpack.c.bf16 %v505_v33, %v503_v29 }
  0x27   : > { %2004 = vmatprep.subr.bf16.mxu1 %v2003_v30  ;;  %v590_v37 = vld [vmem:[%s3245_s1 + $0x458] sm:$0xff]  ;;  %v507_v42 = vld [vmem:[%s3245_s1 + $0x1c0] sm:$0xff]  ;;  %v509_v43 = vld [vmem:[%s3245_s1 + $0x1d0] sm:$0xff] }
  0x28   : > { %1894 = vmatpush1.bf16.msra.mxu0 %v1893_v38  ;;  %v587_v38 = vld [vmem:[%s3245_s1 + $0x440] sm:$0xff]  ;;  %v592_v47 = vld [vmem:[%s3245_s1 + $0x468] sm:$0xff]  ;;  %v594_v48 = vld [vmem:[%s3245_s1 + $0x478] sm:$0xff]  ;;  %v1929_v54 = vpack.c.bf16 %v509_v43, %v507_v42 }
  0x29   : > { %1896 = vmatprep.subr.bf16.mxu0 %v1895_v39  ;;  %2006 = vmatpush1.bf16.msra.mxu1 %v2005_v31  ;;  %v2007_v39 = vpack.c.bf16 %v590_v37, %v588_v36  ;;  %v2009_v44 = vpack.c.bf16 %v589_v40, %v587_v38  ;;  %v514_v49 = vld [vmem:[%s3245_s1 + $0x1f8] sm:$0xff]  ;;  %v2011_v50 = vpack.c.bf16 %v594_v48, %v592_v47  ;;  %v511_v55 = vld [vmem:[%s3245_s1 + $0x1e0] sm:$0xff]  ;;  %v513_v56 = vld [vmem:[%s3245_s1 + $0x1f0] sm:$0xff] }
  0x2a   : > { %v598_v59 = vld [vmem:[%s3245_s1 + $0x498] sm:$0xff]  ;;  %v595_v60 = vld [vmem:[%s3245_s1 + $0x480] sm:$0xff]  ;;  %v597_v61 = vld [vmem:[%s3245_s1 + $0x490] sm:$0xff]  ;;  %v1933_v2 = vpack.c.bf16 %v513_v56, %v511_v55 }
  0x2b   : > { %2008 = vmatprep.subr.bf16.mxu1 %v2007_v39  ;;  %v516_v62 = vld [vmem:[%s3245_s1 + $0x208] sm:$0xff]  ;;  %v2017_v1 = vpack.c.bf16 %v597_v61, %v595_v60  ;;  %v515_v4 = vld [vmem:[%s3245_s1 + $0x200] sm:$0xff]  ;;  %v522_v9 = vld [vmem:[%s3245_s1 + $0x238] sm:$0xff] }
  0x2c   : > { %1898 = vmatpush1.bf16.msra.mxu0 %v1897_v45  ;;  %v1927_v45 = vpack.c.bf16 %v510_v35, %v508_v34  ;;  %v520_v8 = vld [vmem:[%s3245_s1 + $0x228] sm:$0xff]  ;;  %v371_v10 = vld [vmem:[%s2467_s16] sm:$0xff]  ;;  %v377_v13 = vld [vmem:[%s2467_s16 + $0x30] sm:$0xff] }
  0x2d   : > { %1900 = vmatprep.subr.bf16.mxu0 %v1899_v46  ;;  %v512_v46 = vld [vmem:[%s3245_s1 + $0x1e8] sm:$0xff]  ;;  %2010 = vmatpush1.bf16.msra.mxu1 %v2009_v44  ;;  %v599_v12 = vld [vmem:[%s3245_s1 + $0x4a0] sm:$0xff]  ;;  %v521_v16 = vld [vmem:[%s3245_s1 + $0x230] sm:$0xff] }
  0x2e   : > { %2012 = vmatprep.subr.bf16.mxu1 %v2011_v50  ;;  %v519_v15 = vld [vmem:[%s3245_s1 + $0x220] sm:$0xff]  ;;  %v524_v17 = vld [vmem:[%s3245_s1 + $0x248] sm:$0xff]  ;;  %v382_v22 = vld [vmem:[%s2467_s16 + $0x58] sm:$0xff] }
  0x2f   : > { %v375_v19 = vld [vmem:[%s2467_s16 + $0x20] sm:$0xff]  ;;  %v376_v20 = vld [vmem:[%s2467_s16 + $0x28] sm:$0xff]  ;;  %v1941_v21 = vpack.c.bf16 %v521_v16, %v519_v15  ;;  %v525_v25 = vld [vmem:[%s3245_s1 + $0x250] sm:$0xff] }
  0x30   : > { %1902 = vmatpush1.bf16.msra.mxu0 %v1901_v51  ;;  %v591_v51 = vld [vmem:[%s3245_s1 + $0x460] sm:$0xff]  ;;  %v528_v26 = vld [vmem:[%s3245_s1 + $0x268] sm:$0xff]  ;;  %v530_v27 = vld [vmem:[%s3245_s1 + $0x278] sm:$0xff] }
  0x31   : > { %1904 = vmatprep.subr.bf16.mxu0 %v1903_v52  ;;  %v593_v52 = vld [vmem:[%s3245_s1 + $0x470] sm:$0xff]  ;;  %v523_v24 = vld [vmem:[%s3245_s1 + $0x240] sm:$0xff]  ;;  %v532_v35 = vld [vmem:[%s3245_s1 + $0x288] sm:$0xff] }
  0x32   : > { %v2013_v53 = vpack.c.bf16 %v593_v52, %v591_v51  ;;  %v381_v29 = vld [vmem:[%s2467_s16 + $0x50] sm:$0xff]  ;;  %v1945_v30 = vpack.c.bf16 %v525_v25, %v523_v24  ;;  %v387_v31 = vld [vmem:[%s2467_s16 + $0x80] sm:$0xff]  ;;  %v534_v36 = vld [vmem:[%s3245_s1 + $0x298] sm:$0xff] }
  0x33   : > { %v527_v33 = vld [vmem:[%s3245_s1 + $0x260] sm:$0xff]  ;;  %v529_v34 = vld [vmem:[%s3245_s1 + $0x270] sm:$0xff]  ;;  %v386_v38 = vld [vmem:[%s2467_s16 + $0x78] sm:$0xff]  ;;  %v1951_v44 = vpack.c.bf16 %v534_v36, %v532_v35 }
  0x34   : > { %1906 = vmatpush1.bf16.msra.mxu0 %v1905_v57  ;;  %v596_v57 = vld [vmem:[%s3245_s1 + $0x488] sm:$0xff]  ;;  %2014 = vmatpush1.bf16.msra.mxu1 %v2013_v53  ;;  %v385_v37 = vld [vmem:[%s2467_s16 + $0x70] sm:$0xff]  ;;  %v1949_v40 = vpack.c.bf16 %v529_v34, %v527_v33  ;;  %v1356_v43 = vld [vmem:[%s3247_s3 + $0x80] sm:$0xff] }
  0x35   : > { %1908 = vmatprep.subr.bf16.mxu0 %v1907_v58  ;;  %v1931_v58 = vpack.c.bf16 %v514_v49, %v512_v46  ;;  %v392_v39 = vld [vmem:[%s2467_s16 + $0xa8] sm:$0xff]  ;;  %v533_v42 = vld [vmem:[%s3245_s1 + $0x290] sm:$0xff]  ;;  %v1340_v46 = vld [vmem:[%s3247_s3] sm:$0xff] }
  0x36   : > { %v1341_v47 = vld [vmem:[%s3247_s3 + $0x8] sm:$0xff]  ;;  %v538_v49 = vld [vmem:[%s3245_s1 + $0x2b8] sm:$0xff]  ;;  %v1358_v53 = vld [vmem:[%s3247_s3 + $0x90] sm:$0xff] }
  0x37   : > { %v536_v48 = vld [vmem:[%s3245_s1 + $0x2a8] sm:$0xff]  ;;  %v390_v50 = vld [vmem:[%s2467_s16 + $0x98] sm:$0xff]  ;;  %v2021_v52 = vpack.c.bf16 %v1341_v47, %v1340_v46  ;;  %v391_v55 = vld [vmem:[%s2467_s16 + $0xa0] sm:$0xff] }
  0x38   : > { %1910 = vmatpush1.bf16.msra.mxu0 %v1909_v63  ;;  %v518_v63 = vld [vmem:[%s3245_s1 + $0x218] sm:$0xff]  ;;  %v1955_v60 = vpack.c.bf16 %v538_v49, %v536_v48  ;;  %v535_v61 = vld [vmem:[%s3245_s1 + $0x2a0] sm:$0xff]  ;;  %v544_v15 = vld [vmem:[%s3245_s1 + $0x2e8] sm:$0xff] }
  0x39   : > { %1912 = vmatprep.subr.bf16.mxu0 %v1911_v0  ;;  %v2015_v0 = vpack.c.bf16 %v598_v59, %v596_v57  ;;  %v1935_v3 = vpack.c.bf16 %v518_v63, %v516_v62  ;;  %v1342_v57 = vld [vmem:[%s3247_s3 + $0x10] sm:$0xff]  ;;  %v540_v63 = vld [vmem:[%s3245_s1 + $0x2c8] sm:$0xff]  ;;  %v546_v16 = vld [vmem:[%s3245_s1 + $0x2f8] sm:$0xff] }
  0x3a   : > { %v397_v59 = vld [vmem:[%s2467_s16 + $0xd0] sm:$0xff]  ;;  %v1347_v25 = vld [vmem:[%s3247_s3 + $0x38] sm:$0xff]  ;;  %v1364_v35 = vld [vmem:[%s3247_s3 + $0xc0] sm:$0xff] }
  0x3b   : > { %2016 = vmatprep.subr.bf16.mxu1 %v2015_v0  ;;  %v537_v62 = vld [vmem:[%s3245_s1 + $0x2b0] sm:$0xff]  ;;  %v542_v0 = vld [vmem:[%s3245_s1 + $0x2d8] sm:$0xff]  ;;  %v1365_v36 = vld [vmem:[%s3247_s3 + $0xc8] sm:$0xff] }
  0x3c   : > { %1914 = vmatpush1.bf16.msra.mxu0 %v1913_v5  ;;  %v517_v5 = vld [vmem:[%s3245_s1 + $0x210] sm:$0xff]  ;;  %2018 = vmatpush1.bf16.msra.mxu1 %v2017_v1  ;;  %v395_v1 = vld [vmem:[%s2467_s16 + $0xc0] sm:$0xff]  ;;  %v554_v46 = vld [vmem:[%s3245_s1 + $0x338] sm:$0xff]  ;;  %v2035_v48 = vpack.c.bf16 %v1365_v36, %v1364_v35 }
  0x3d   : > { %1916 = vmatprep.subr.bf16.mxu0 %v1915_v6  ;;  %v600_v6 = vld [vmem:[%s3245_s1 + $0x4a8] sm:$0xff]  ;;  %v1937_v11 = vpack.c.bf16 %v517_v5, %v515_v4  ;;  %v1360_v4 = vld [vmem:[%s3247_s3 + $0xa0] sm:$0xff]  ;;  %v1346_v24 = vld [vmem:[%s3247_s3 + $0x30] sm:$0xff] }
  0x3e   : > { %1024 = vmatprep.subr.mxu1 %v600_v6  ;;  %v1361_v5 = vld [vmem:[%s3247_s3 + $0xa8] sm:$0xff]  ;;  %v2033_v34 = vpack.c.bf16 %v1347_v25, %v1346_v24  ;;  %v410_v47 = vld [vmem:[%s2467_s16 + $0x138] sm:$0xff]  ;;  %v425_v25 = vld [vmem:[%s2467_s16 + $0x1b0] sm:$0xff] }
  0x3f   : > { %v396_v6 = vld [vmem:[%s2467_s16 + $0xc8] sm:$0xff]  ;;  %v566_v24 = vld [vmem:[%s3245_s1 + $0x398] sm:$0xff]  ;;  %v431_v35 = vld [vmem:[%s2467_s16 + $0x1e0] sm:$0xff] }
  0x40   : > { %1918 = vmatpush1.bf16.msra.mxu0 %v1917_v14  ;;  %v1939_v14 = vpack.c.bf16 %v522_v9, %v520_v8  ;;  %1025 = vmatpush1.msra.mxu1 %v599_v12  ;;  %v1957_v8 = vpack.c.bf16 %v537_v62, %v535_v61  ;;  %v1344_v9 = vld [vmem:[%s3247_s3 + $0x20] sm:$0xff]  ;;  %v1959_v12 = vpack.c.bf16 %v542_v0, %v540_v63  ;;  %v558_v61 = vld [vmem:[%s3245_s1 + $0x358] sm:$0xff] }
  0x41   : > { %1920 = vmatprep.subr.bf16.mxu0 %v1919_v18  ;;  %v526_v18 = vld [vmem:[%s3245_s1 + $0x258] sm:$0xff]  ;;  %1719 = vmatmul.mubr.msk.f32.vlgmr.msra.gmra.mrb[0].mxu1 %vm633_vm0, %v375_v19  ;;  %v415_v62 = vld [vmem:[%s2467_s16 + $0x160] sm:$0xff] }
  0x42   : > { %v1943_v23 = vpack.c.bf16 %v526_v18, %v524_v17  ;;  %1074 = vmatprep.mubr.f32.mxu1 %v2278_v7  ;;  %v400_v17 = vld [vmem:[%s2467_s16 + $0xe8] sm:$0xff]  ;;  %v2027_v18 = vpack.c.bf16 %v1361_v5, %v1360_v4  ;;  %v1352_v5 = vld [vmem:[%s3247_s3 + $0x60] sm:$0xff] }
  0x44   : > { %1922 = vmatpush1.bf16.msra.mxu0 %v1921_v28  ;;  %v380_v28 = vld [vmem:[%s2467_s16 + $0x48] sm:$0xff] }
  0x45   : > { %1924 = vmatprep.subr.bf16.mxu0 %v1923_v32  ;;  %v1947_v32 = vpack.c.bf16 %v530_v27, %v528_v26  ;;  %1720 = vmatmul.mubr.msk.f32.gmra.mrb[2].mxu1 %vm633_vm0, %v380_v28  ;;  %v407_v26 = vld [vmem:[%s2467_s16 + $0x120] sm:$0xff]  ;;  %v1963_v27 = vpack.c.bf16 %v546_v16, %v544_v15 }
  0x46   : > { %1080 = vmatprep.mubr.f32.mxu1 %v2278_v7  ;;  %v543_v28 = vld [vmem:[%s3245_s1 + $0x2e0] sm:$0xff] }
  0x48   : > { %1926 = vmatpush1.bf16.msra.mxu0 %v1925_v41  ;;  %v531_v41 = vld [vmem:[%s3245_s1 + $0x280] sm:$0xff] }
  0x49   : > { %1928 = vmatprep.subr.bf16.mxu0 %v1927_v45  ;;  %1721 = vmatmul.mubr.msk.f32.gmra.mrb[4].mxu1 %vm633_vm0, %v385_v37  ;;  %v1357_v45 = vld [vmem:[%s3247_s3 + $0x88] sm:$0xff]  ;;  %v1953_v56 = vpack.c.bf16 %v533_v42, %v531_v41  ;;  %v406_v37 = vld [vmem:[%s2467_s16 + $0x118] sm:$0xff] }
  0x4a   : > { %1086 = vmatprep.mubr.f32.mxu1 %v2278_v7  ;;  %v2019_v51 = vpack.c.bf16 %v1357_v45, %v1356_v43  ;;  %v412_v41 = vld [vmem:[%s2467_s16 + $0x148] sm:$0xff]  ;;  %v547_v43 = vld [vmem:[%s3245_s1 + $0x300] sm:$0xff] }
  0x4b   : > { %v552_v45 = vld [vmem:[%s3245_s1 + $0x328] sm:$0xff] }
  0x4c   : > { %1930 = vmatpush1.bf16.msra.mxu0 %v1929_v54  ;;  %v1359_v54 = vld [vmem:[%s3247_s3 + $0x98] sm:$0xff]  ;;  %2020 = vmatprep.subr.bf16.mxu1 %v2019_v51 }
  0x4d   : > { %1932 = vmatprep.subr.bf16.mxu0 %v1931_v58  ;;  %v1343_v58 = vld [vmem:[%s3247_s3 + $0x18] sm:$0xff]  ;;  %1722 = vmatmul.mubr.msk.f32.gmra.mrb[6].mxu1 %vm633_vm0, %v390_v50  ;;  %v1366_v50 = vld [vmem:[%s3247_s3 + $0xd0] sm:$0xff] }
  0x4e   : > { %1092 = vmatprep.mubr.f32.mxu1 %v2278_v7  ;;  %2022 = vmatpush3.bf16.msra.mxu1 %v2021_v52  ;;  %v1367_v51 = vld [vmem:[%s3247_s3 + $0xd8] sm:$0xff]  ;;  %v411_v52 = vld [vmem:[%s2467_s16 + $0x140] sm:$0xff] }
  0x4f   : > { %v2039_v63 = vpack.c.bf16 %v1367_v51, %v1366_v50  ;;  %v576_v50 = vld [vmem:[%s3245_s1 + $0x3e8] sm:$0xff]  ;;  %v578_v51 = vld [vmem:[%s3245_s1 + $0x3f8] sm:$0xff] }
  0x50   : > { %1934 = vmatpush1.bf16.msra.mxu0 %v1933_v2  ;;  %v2023_v2 = vpack.c.bf16 %v1359_v54, %v1358_v53  ;;  %v1350_v54 = vld [vmem:[%s3247_s3 + $0x50] sm:$0xff] }
  0x51   : > { %1936 = vmatprep.subr.bf16.mxu0 %v1935_v3  ;;  %v2025_v3 = vpack.c.bf16 %v1343_v58, %v1342_v57  ;;  %1723 = vmatmul.mubr.msk.f32.gmra.mrb[8].mxu1 %vm633_vm0, %v395_v1  ;;  %v1971_v57 = vpack.c.bf16 %v554_v46, %v552_v45  ;;  %v551_v58 = vld [vmem:[%s3245_s1 + $0x320] sm:$0xff]  ;;  %v442_v46 = vld [vmem:[%s2467_s16 + $0x238] sm:$0xff] }
  0x52   : > { %1098 = vmatprep.mubr.f32.mxu1 %v2278_v7  ;;  %2024 = vmatprep.subr.bf16.mxu1 %v2023_v2  ;;  %v1368_v1 = vld [vmem:[%s3247_s3 + $0xe0] sm:$0xff]  ;;  %v1369_v2 = vld [vmem:[%s3247_s3 + $0xe8] sm:$0xff] }
  0x53   : > { %747 = vmatmul.mubr.f32.vlgmr.msra.gmra.mrb[0].mxu0 %v371_v10  ;;  %v1345_v10 = vld [vmem:[%s3247_s3 + $0x28] sm:$0xff]  ;;  %2026 = vmatpush3.bf16.msra.mxu1 %v2025_v3  ;;  %v2043_v15 = vpack.c.bf16 %v1369_v2, %v1368_v1  ;;  %v379_v1 = vld [vmem:[%s2467_s16 + $0x40] sm:$0xff]  ;;  %v378_v2 = vld [vmem:[%s2467_s16 + $0x38] sm:$0xff] }
  0x54   : > { %1938 = vmatpush1.bf16.msra.mxu0 %v1937_v11  ;;  %752 = vmatprep.mubr.f32.mxu0 %v377_v13  ;;  %v402_v11 = vld [vmem:[%s2467_s16 + $0xf8] sm:$0xff]  ;;  %v539_v13 = vld [vmem:[%s3245_s1 + $0x2c0] sm:$0xff]  ;;  %v2029_v19 = vpack.c.bf16 %v1345_v10, %v1344_v9  ;;  %v416_v3 = vld [vmem:[%s2467_s16 + $0x168] sm:$0xff] }
  0x55   : > { %1940 = vmatprep.subr.bf16.mxu0 %v1939_v14  ;;  %v541_v14 = vld [vmem:[%s3245_s1 + $0x2d0] sm:$0xff]  ;;  %1724 = vmatmul.mubr.msk.f32.gmra.mrb[10].mxu1 %vm633_vm0, %v400_v17  ;;  %v555_v10 = vld [vmem:[%s3245_s1 + $0x340] sm:$0xff] }
  0x56   : > { %1104 = vmatprep.mubr.f32.mxu1 %v2278_v7  ;;  %2028 = vmatprep.subr.bf16.mxu1 %v2027_v18  ;;  %v421_v17 = vld [vmem:[%s2467_s16 + $0x190] sm:$0xff] }
  0x57   : > { %753 = vmatmul.mubr.f32.gmra.mrb[2].mxu0 %v376_v20  ;;  %v1362_v20 = vld [vmem:[%s3247_s3 + $0xb0] sm:$0xff]  ;;  %2030 = vmatpush3.bf16.msra.mxu1 %v2029_v19  ;;  %v427_v19 = vld [vmem:[%s2467_s16 + $0x1c0] sm:$0xff] }
  0x58   : > { %1942 = vmatpush1.bf16.msra.mxu0 %v1941_v21  ;;  %758 = vmatprep.mubr.f32.mxu0 %v382_v22  ;;  %v1363_v21 = vld [vmem:[%s3247_s3 + $0xb8] sm:$0xff]  ;;  %v401_v22 = vld [vmem:[%s2467_s16 + $0xf0] sm:$0xff] }
  0x59   : > { %1944 = vmatprep.subr.bf16.mxu0 %v1943_v23  ;;  %v1961_v23 = vpack.c.bf16 %v541_v14, %v539_v13  ;;  %v2031_v33 = vpack.c.bf16 %v1363_v21, %v1362_v20  ;;  %v562_v13 = vld [vmem:[%s3245_s1 + $0x378] sm:$0xff]  ;;  %v420_v14 = vld [vmem:[%s2467_s16 + $0x188] sm:$0xff]  ;;  %v559_v21 = vld [vmem:[%s3245_s1 + $0x360] sm:$0xff] }
  0x5b   : > { %759 = vmatmul.mubr.f32.gmra.mrb[4].mxu0 %v381_v29  ;;  %v545_v29 = vld [vmem:[%s3245_s1 + $0x2f0] sm:$0xff]  ;;  %2032 = vmatprep.subr.bf16.mxu1 %v2031_v33  ;;  %v570_v33 = vld [vmem:[%s3245_s1 + $0x3b8] sm:$0xff] }
  0x5c   : > { %1946 = vmatpush1.bf16.msra.mxu0 %v1945_v30  ;;  %764 = vmatprep.mubr.f32.mxu0 %v387_v31  ;;  %v548_v30 = vld [vmem:[%s3245_s1 + $0x308] sm:$0xff]  ;;  %v550_v31 = vld [vmem:[%s3245_s1 + $0x318] sm:$0xff] }
  0x5d   : > { %1948 = vmatprep.subr.bf16.mxu0 %v1947_v32  ;;  %v405_v32 = vld [vmem:[%s2467_s16 + $0x110] sm:$0xff]  ;;  %v1967_v42 = vpack.c.bf16 %v550_v31, %v548_v30  ;;  %2034 = vmatpush3.bf16.msra.mxu1 %v2033_v34  ;;  %v563_v30 = vld [vmem:[%s3245_s1 + $0x380] sm:$0xff]  ;;  %v430_v34 = vld [vmem:[%s2467_s16 + $0x1d8] sm:$0xff] }
  0x5e   : > { %1725 = vmatmul.mubr.msk.f32.gmra.mrb[12].mxu1 %vm633_vm0, %v405_v32  ;;  %2036 = vmatprep.subr.bf16.mxu1 %v2035_v48  ;;  %v565_v31 = vld [vmem:[%s3245_s1 + $0x390] sm:$0xff]  ;;  %v568_v32 = vld [vmem:[%s3245_s1 + $0x3a8] sm:$0xff]  ;;  %v571_v48 = vld [vmem:[%s3245_s1 + $0x3c0] sm:$0xff] }
  0x5f   : > { %765 = vmatmul.mubr.f32.gmra.mrb[6].mxu0 %v386_v38  ;;  %v1965_v38 = vpack.c.bf16 %v545_v29, %v543_v28  ;;  %1110 = vmatprep.mubr.f32.mxu1 %v2278_v7  ;;  %v432_v28 = vld [vmem:[%s2467_s16 + $0x1e8] sm:$0xff]  ;;  %v1985_v36 = vpack.c.bf16 %v565_v31, %v563_v30  ;;  %v449_v30 = vld [vmem:[%s2467_s16 + $0x270] sm:$0xff] }
  0x60   : > { %1950 = vmatpush1.bf16.msra.mxu0 %v1949_v40  ;;  %770 = vmatprep.mubr.f32.mxu0 %v392_v39  ;;  %v1348_v39 = vld [vmem:[%s3247_s3 + $0x40] sm:$0xff]  ;;  %v1349_v40 = vld [vmem:[%s3247_s3 + $0x48] sm:$0xff] }
  0x61   : > { %1952 = vmatprep.subr.bf16.mxu0 %v1951_v44  ;;  %v549_v44 = vld [vmem:[%s3245_s1 + $0x310] sm:$0xff]  ;;  %v2037_v49 = vpack.c.bf16 %v1349_v40, %v1348_v39  ;;  %v567_v39 = vld [vmem:[%s3245_s1 + $0x3a0] sm:$0xff]  ;;  %v448_v31 = vld [vmem:[%s2467_s16 + $0x268] sm:$0xff] }
  0x62   : > { %v1969_v53 = vpack.c.bf16 %v549_v44, %v547_v43  ;;  %1726 = vmatmul.mubr.msk.f32.gmra.mrb[14].mxu1 %vm633_vm0, %v410_v47  ;;  %v569_v40 = vld [vmem:[%s3245_s1 + $0x3b0] sm:$0xff]  ;;  %v435_v43 = vld [vmem:[%s2467_s16 + $0x200] sm:$0xff]  ;;  %v436_v44 = vld [vmem:[%s2467_s16 + $0x208] sm:$0xff] }
  0x63   : > { %771 = vmatmul.mubr.f32.gmra.mrb[8].mxu0 %v391_v55  ;;  %v1351_v55 = vld [vmem:[%s3247_s3 + $0x58] sm:$0xff]  ;;  %1116 = vmatprep.mubr.f32.mxu1 %v2278_v7  ;;  %v1989_v45 = vpack.c.bf16 %v569_v40, %v567_v39 }
  0x64   : > { %1954 = vmatpush1.bf16.msra.mxu0 %v1953_v56  ;;  %776 = vmatprep.mubr.f32.mxu0 %v397_v59  ;;  %v417_v56 = vld [vmem:[%s2467_s16 + $0x170] sm:$0xff]  ;;  %v2041_v0 = vpack.c.bf16 %v1351_v55, %v1350_v54  ;;  %v447_v55 = vld [vmem:[%s2467_s16 + $0x260] sm:$0xff] }
  0x65   : > { %1956 = vmatprep.subr.bf16.mxu0 %v1955_v60  ;;  %v553_v59 = vld [vmem:[%s3245_s1 + $0x330] sm:$0xff]  ;;  %v556_v60 = vld [vmem:[%s3245_s1 + $0x348] sm:$0xff]  ;;  %2038 = vmatpush3.bf16.msra.mxu1 %v2037_v49 }
  0x66   : > { %v1973_v4 = vpack.c.bf16 %v553_v59, %v551_v58  ;;  %v1975_v9 = vpack.c.bf16 %v558_v61, %v556_v60  ;;  %1727 = vmatmul.mubr.msk.f32.gmra.mrb[16].mxu1 %vm633_vm0, %v415_v62  ;;  %2040 = vmatprep.subr.bf16.mxu1 %v2039_v63  ;;  %v573_v49 = vld [vmem:[%s3245_s1 + $0x3d0] sm:$0xff]  ;;  %v446_v60 = vld [vmem:[%s2467_s16 + $0x258] sm:$0xff] }
  0x67   : > { %777 = vmatmul.mubr.f32.gmra.mrb[10].mxu0 %v396_v6  ;;  %v1353_v6 = vld [vmem:[%s3247_s3 + $0x68] sm:$0xff]  ;;  %1122 = vmatprep.mubr.f32.mxu1 %v2278_v7  ;;  %v1993_v54 = vpack.c.bf16 %v573_v49, %v571_v48  ;;  %v577_v58 = vld [vmem:[%s3245_s1 + $0x3f0] sm:$0xff]  ;;  %v374_v62 = vld [vmem:[%s2467_s16 + $0x18] sm:$0xff] }
  0x68   : > { %1958 = vmatpush1.bf16.msra.mxu0 %v1957_v8  ;;  %782 = vmatprep.mubr.f32.mxu0 %v402_v11  ;;  %v422_v8 = vld [vmem:[%s2467_s16 + $0x198] sm:$0xff]  ;;  %v557_v11 = vld [vmem:[%s3245_s1 + $0x350] sm:$0xff]  ;;  %v2045_v16 = vpack.c.bf16 %v1353_v6, %v1352_v5  ;;  %v388_v6 = vld [vmem:[%s2467_s16 + $0x88] sm:$0xff] }
  0x69   : > { %1960 = vmatprep.subr.bf16.mxu0 %v1959_v12  ;;  %v560_v12 = vld [vmem:[%s3245_s1 + $0x368] sm:$0xff]  ;;  %2042 = vmatpush3.bf16.msra.mxu1 %v2041_v0  ;;  %v1977_v18 = vpack.c.bf16 %v557_v11, %v555_v10  ;;  %v445_v59 = vld [vmem:[%s2467_s16 + $0x250] sm:$0xff]  ;;  %v450_v63 = vld [vmem:[%s2467_s16 + $0x278] sm:$0xff] }
  0x6a   : > { %v1979_v20 = vpack.c.bf16 %v562_v13, %v560_v12  ;;  %1728 = vmatmul.mubr.msk.f32.gmra.mrb[18].mxu1 %vm633_vm0, %v420_v14  ;;  %2044 = vmatprep.subr.bf16.mxu1 %v2043_v15  ;;  %v373_v0 = vld [vmem:[%s2467_s16 + $0x10] sm:$0xff]  ;;  %v399_v10 = vld [vmem:[%s2467_s16 + $0xe0] sm:$0xff]  ;;  %v398_v11 = vld [vmem:[%s2467_s16 + $0xd8] sm:$0xff] }
  0x6b   : > { %783 = vmatmul.mubr.f32.gmra.mrb[12].mxu0 %v401_v22  ;;  %v561_v22 = vld [vmem:[%s3245_s1 + $0x370] sm:$0xff]  ;;  %1128 = vmatprep.mubr.f32.mxu1 %v2278_v7  ;;  %v404_v12 = vld [vmem:[%s2467_s16 + $0x108] sm:$0xff]  ;;  %v403_v13 = vld [vmem:[%s2467_s16 + $0x100] sm:$0xff] }
  0x6c   : > { %1962 = vmatpush1.bf16.msra.mxu0 %v1961_v23  ;;  %788 = vmatprep.mubr.f32.mxu0 %v407_v26  ;;  %v564_v23 = vld [vmem:[%s3245_s1 + $0x388] sm:$0xff]  ;;  %v426_v26 = vld [vmem:[%s2467_s16 + $0x1b8] sm:$0xff]  ;;  %v389_v5 = vld [vmem:[%s2467_s16 + $0x90] sm:$0xff] }
  0x6d   : > { %1964 = vmatprep.subr.bf16.mxu0 %v1963_v27  ;;  %2046 = vmatpush3.bf16.msra.mxu1 %v2045_v16  ;;  %v1981_v27 = vpack.c.bf16 %v561_v22, %v559_v21  ;;  %v1983_v29 = vpack.c.bf16 %v566_v24, %v564_v23  ;;  %v409_v14 = vld [vmem:[%s2467_s16 + $0x130] sm:$0xff]  ;;  %v408_v15 = vld [vmem:[%s2467_s16 + $0x128] sm:$0xff]  ;;  %v414_v16 = vld [vmem:[%s2467_s16 + $0x158] sm:$0xff] }
  0x6e   : > { %1729 = vmatmul.mubr.msk.f32.gmra.mrb[20].mxu1 %vm633_vm0, %v425_v25  ;;  %v423_v21 = vld [vmem:[%s2467_s16 + $0x1a0] sm:$0xff]  ;;  %v429_v22 = vld [vmem:[%s2467_s16 + $0x1d0] sm:$0xff]  ;;  %v428_v23 = vld [vmem:[%s2467_s16 + $0x1c8] sm:$0xff] }
  0x6f   : > { %789 = vmatmul.mubr.f32.gmra.mrb[14].mxu0 %v406_v37  ;;  %1134 = vmatprep.mubr.f32.mxu1 %v2278_v7  ;;  %v437_v37 = vld [vmem:[%s2467_s16 + $0x210] sm:$0xff]  ;;  %v434_v24 = vld [vmem:[%s2467_s16 + $0x1f8] sm:$0xff] }
  0x70   : > { %1966 = vmatpush1.bf16.msra.mxu0 %v1965_v38  ;;  %794 = vmatprep.mubr.f32.mxu0 %v412_v41  ;;  %v1987_v38 = vpack.c.bf16 %v570_v33, %v568_v32  ;;  %v572_v41 = vld [vmem:[%s3245_s1 + $0x3c8] sm:$0xff]  ;;  %v433_v25 = vld [vmem:[%s2467_s16 + $0x1f0] sm:$0xff]  ;;  %v1371_v33 = vld [vmem:[%s3247_s3 + $0xf8] sm:$0xff] }
  0x71   : > { %1968 = vmatprep.subr.bf16.mxu0 %v1967_v42  ;;  %v574_v42 = vld [vmem:[%s3245_s1 + $0x3d8] sm:$0xff]  ;;  %v1370_v32 = vld [vmem:[%s3247_s3 + $0xf0] sm:$0xff] }
  0x72   : > { %1730 = vmatmul.mubr.msk.f32.gmra.mrb[22].mxu1 %vm633_vm0, %v430_v34  ;;  %v1991_v47 = vpack.c.bf16 %v574_v42, %v572_v41  ;;  %v2047_v34 = vpack.c.bf16 %v1371_v33, %v1370_v32 }
  0x73   : > { %795 = vmatmul.mubr.f32.gmra.mrb[16].mxu0 %v411_v52  ;;  %1140 = vmatprep.mubr.f32.mxu1 %v2278_v7  ;;  %v440_v52 = vld [vmem:[%s2467_s16 + $0x228] sm:$0xff] }
  0x74   : > { %1970 = vmatpush1.bf16.msra.mxu0 %v1969_v53  ;;  %800 = vmatprep.mubr.f32.mxu0 %v417_v56  ;;  %v441_v53 = vld [vmem:[%s2467_s16 + $0x230] sm:$0xff]  ;;  %v1995_v56 = vpack.c.bf16 %v578_v51, %v576_v50 }
  0x75   : > { %1972 = vmatprep.subr.bf16.mxu0 %v1971_v57  ;;  %v575_v57 = vld [vmem:[%s3245_s1 + $0x3e0] sm:$0xff]  ;;  %2048 = vmatprep.subr.bf16.mxu1 %v2047_v34 }
  0x76   : > { %1731 = vmatmul.mubr.msk.f32.gmra.mrb[24].mxu1 %vm633_vm0, %v435_v43  ;;  %v1997_v61 = vpack.c.bf16 %v577_v58, %v575_v57 }
  0x77   : > { %801 = vmatmul.mubr.f32.gmra.mrb[18].mxu0 %v416_v3  ;;  %1146 = vmatprep.mubr.f32.mxu1 %v2278_v7  ;;  %v384_v3 = vld [vmem:[%s2467_s16 + $0x68] sm:$0xff] }
  0x78   : > { %1974 = vmatpush1.bf16.msra.mxu0 %v1973_v4  ;;  %806 = vmatprep.mubr.f32.mxu0 %v422_v8  ;;  %v383_v4 = vld [vmem:[%s2467_s16 + $0x60] sm:$0xff]  ;;  %v394_v8 = vld [vmem:[%s2467_s16 + $0xb8] sm:$0xff] }
  0x79   : > { %1976 = vmatprep.subr.bf16.mxu0 %v1975_v9  ;;  %v393_v9 = vld [vmem:[%s2467_s16 + $0xb0] sm:$0xff] }
  0x7a   : > { %1732 = vmatmul.mubr.msk.f32.gmra.mrb[26].mxu1 %vm633_vm0, %v440_v52 }
  0x7b   : > { %807 = vmatmul.mubr.f32.gmra.mrb[20].mxu0 %v421_v17  ;;  %1152 = vmatprep.mubr.f32.mxu1 %v2278_v7  ;;  %v413_v17 = vld [vmem:[%s2467_s16 + $0x150] sm:$0xff] }
  0x7c   : > { %1978 = vmatpush1.bf16.msra.mxu0 %v1977_v18  ;;  %812 = vmatprep.mubr.f32.mxu0 %v427_v19  ;;  %v419_v18 = vld [vmem:[%s2467_s16 + $0x180] sm:$0xff]  ;;  %v418_v19 = vld [vmem:[%s2467_s16 + $0x178] sm:$0xff] }
  0x7d   : > { %1980 = vmatprep.subr.bf16.mxu0 %v1979_v20  ;;  %v424_v20 = vld [vmem:[%s2467_s16 + $0x1a8] sm:$0xff] }
  0x7e   : > { %1733 = vmatmul.mubr.msk.f32.gmra.mrb[28].mxu1 %vm633_vm0, %v445_v59 }
  0x7f   : > { %813 = vmatmul.mubr.f32.gmra.mrb[22].mxu0 %v426_v26  ;;  %1158 = vmatprep.mubr.f32.mxu1 %v2278_v7  ;;  %v439_v26 = vld [vmem:[%s2467_s16 + $0x220] sm:$0xff] }
  0x80   : > { %1982 = vmatpush1.bf16.msra.mxu0 %v1981_v27  ;;  %818 = vmatprep.mubr.f32.mxu0 %v432_v28  ;;  %v438_v27 = vld [vmem:[%s2467_s16 + $0x218] sm:$0xff]  ;;  %v444_v28 = vld [vmem:[%s2467_s16 + $0x248] sm:$0xff] }
  0x81   : > { %1984 = vmatprep.subr.bf16.mxu0 %v1983_v29  ;;  %v443_v29 = vld [vmem:[%s2467_s16 + $0x240] sm:$0xff]  ;;  %s2198_s16 = scalar_lea.vmem %s3199_s9, 16 }
  0x82   : > { %1734 = vmatmul.mubr.msk.f32.gmra.mrb[30].mxu1 %vm633_vm0, %v450_v63  ;;  %v1266_v63 = vlaneseq  ;;  %p2199_p12 = scmp.ne.s32.totalorder %s3199_s9, %s2198_s16  ;;  %p2206_p2 = scmp.lt.s32.totalorder %s2204_s20, %s2198_s16 }
  0x83   : > { %819 = vmatmul.mubr.f32.gmra.mrb[24].mxu0 %v431_v35  ;;  %v1354_v35 = vld [vmem:[%s3247_s3 + $0x70] sm:$0xff] }
  0x84   : > { %1986 = vmatpush1.bf16.msra.mxu0 %v1985_v36  ;;  %824 = vmatprep.mubr.f32.mxu0 %v437_v37  ;;  %v1355_v36 = vld [vmem:[%s3247_s3 + $0x78] sm:$0xff]  ;;  %p2200_p13 = pnand %p2199_p12, %p2365_p4  ;;  %p2207_p3 = por %p2206_p2, %p2205_p1 }
  0x85   : > { %1988 = vmatprep.subr.bf16.mxu0 %v1987_v38  ;;  %v2049_v37 = vpack.c.bf16 %v1355_v36, %v1354_v35 }
  0x86   : > { %p2201_p0 = pneg %p2200_p13 }
  0x87   : > { %825 = vmatmul.mubr.f32.gmra.mrb[26].mxu0 %v436_v44  ;;  %2050 = vmatpush3.bf16.msra.mxu1 %v2049_v37 }
  0x88   : > { %1990 = vmatpush1.bf16.msra.mxu0 %v1989_v45  ;;  %830 = vmatprep.mubr.f32.mxu0 %v442_v46  ;;  %p2208_p5 = pnand %p2207_p3, %p2201_p0 }
  0x89   : > { %1992 = vmatprep.subr.bf16.mxu0 %v1991_v47 }
  0x8b   : > { %831 = vmatmul.mubr.f32.gmra.mrb[28].mxu0 %v441_v53 }
  0x8c   : > { %1994 = vmatpush1.bf16.msra.mxu0 %v1993_v54  ;;  %836 = vmatprep.mubr.f32.mxu0 %v447_v55 }
  0x8d   : > { %1996 = vmatprep.subr.bf16.mxu0 %v1995_v56 }
  0x8f   : > { %837 = vmatmul.mubr.f32.gmra.mrb[30].mxu0 %v446_v60 }
  0x90   : > { %1998 = vmatpush1.bf16.msra.mxu0 %v1997_v61  ;;  %907 = vmatprep.mubr.f32.mxu0 %v374_v62 }
  0x93   : > { %908 = vmatmul.mubr.f32.vlgmr.msra.gmra.mrb[0].mxu0 %v373_v0 }
  0x94   : > { %913 = vmatprep.mubr.f32.mxu0 %v379_v1 }
  0x97   : > { %914 = vmatmul.mubr.f32.gmra.mrb[2].mxu0 %v378_v2  ;;  %v1267_v2 = vshrl.u32 %v1266_v63, 7 }
  0x98   : > { %919 = vmatprep.mubr.f32.mxu0 %v384_v3 }
  0x9b   : > { %920 = vmatmul.mubr.f32.gmra.mrb[4].mxu0 %v383_v4 }
  0x9c   : > { %925 = vmatprep.mubr.f32.mxu0 %v389_v5  ;;  %v1268_v5 = vsub.s32 0, %v1267_v2 }
  0x9f   : > { %926 = vmatmul.mubr.f32.gmra.mrb[6].mxu0 %v388_v6 }
  0xa0   : > { %931 = vmatprep.mubr.f32.mxu0 %v394_v8  ;;  %v1264_v8 = vld [vmem:[%s3246_s2] sm:$0x3] }
  0xa3   : > { %932 = vmatmul.mubr.f32.gmra.mrb[8].mxu0 %v393_v9  ;;  %v1272_v9 = vsub.s32 1, %v1267_v2 }
  0xa4   : > { %937 = vmatprep.mubr.f32.mxu0 %v399_v10 }
  0xa7   : > { %938 = vmatmul.mubr.f32.gmra.mrb[10].mxu0 %v398_v11  ;;  %v3097_v11 = vrot.slane %v1264_v8, %v1268_v5 }
  0xa8   : > { %943 = vmatprep.mubr.f32.mxu0 %v404_v12 }
  0xab   : > { %944 = vmatmul.mubr.f32.gmra.mrb[12].mxu0 %v403_v13 }
  0xac   : > { %949 = vmatprep.mubr.f32.mxu0 %v409_v14  ;;  %v3101_v14 = vrot.slane %v1264_v8, %v1272_v9 }
  0xaf   : > { %950 = vmatmul.mubr.f32.gmra.mrb[14].mxu0 %v408_v15 }
  0xb0   : > { %955 = vmatprep.mubr.f32.mxu0 %v414_v16 }
  0xb3   : > { %956 = vmatmul.mubr.f32.gmra.mrb[16].mxu0 %v413_v17 }
  0xb4   : > { %961 = vmatprep.mubr.f32.mxu0 %v419_v18 }
  0xb7   : > { %962 = vmatmul.mubr.f32.gmra.mrb[18].mxu0 %v418_v19 }
  0xb8   : > { %967 = vmatprep.mubr.f32.mxu0 %v424_v20 }
  0xbb   : > { %968 = vmatmul.mubr.f32.gmra.mrb[20].mxu0 %v423_v21 }
  0xbc   : > { %973 = vmatprep.mubr.f32.mxu0 %v429_v22 }
  0xbf   : > { %974 = vmatmul.mubr.f32.gmra.mrb[22].mxu0 %v428_v23 }
  0xc0   : > { %979 = vmatprep.mubr.f32.mxu0 %v434_v24 }
  0xc3   : > { %980 = vmatmul.mubr.f32.gmra.mrb[24].mxu0 %v433_v25 }
  0xc4   : > { %985 = vmatprep.mubr.f32.mxu0 %v439_v26 }
  0xc7   : > { %986 = vmatmul.mubr.f32.gmra.mrb[26].mxu0 %v438_v27 }
  0xc8   : > { %991 = vmatprep.mubr.f32.mxu0 %v444_v28 }
  0xcb   : > { %992 = vmatmul.mubr.f32.gmra.mrb[28].mxu0 %v443_v29 }
  0xcc   : > { %997 = vmatprep.mubr.f32.mxu0 %v449_v30 }
  0xcf   : > { %998 = vmatmul.mubr.f32.gmra.mrb[30].mxu0 %v448_v31 }
 0x114   : > { %v1070_v38 = vpop.f32.mrb[0].mxu1 }
 0x115   : > { %v1072_v39 = vpop.f32.mrb[1].mxu1 }
 0x118   : > { %v1076_v40 = vpop.f32.mrb[2].mxu1 }
 0x119   : > { %v1078_v41 = vpop.f32.mrb[3].mxu1 }
 0x11c   : > { %v1082_v42 = vpop.f32.mrb[4].mxu1 }
 0x11d   : > { %v1084_v43 = vpop.f32.mrb[5].mxu1 }
 0x120   : > { %v1088_v44 = vpop.f32.mrb[6].mxu1 }
 0x121   : > { %v1090_v45 = vpop.f32.mrb[7].mxu1 }
 0x124   : > { %v3048_v46 = vpop.f32.mrb[8].mxu1 }
 0x125   : > { %v3050_v47 = vpop.f32.mrb[9].mxu1 }
 0x128   : > { %v3052_v48 = vpop.f32.mrb[10].mxu1 }
 0x129   : > { %v3054_v49 = vpop.f32.mrb[11].mxu1 }
 0x131   : > { %v3056_v50 = vpop.f32.mrb[12].mxu1 }
 0x132   : > { %v3058_v51 = vpop.f32.mrb[13].mxu1 }
 0x135   : > { %v3060_v52 = vpop.f32.mrb[14].mxu1 }
 0x136   : > { %v3062_v53 = vpop.f32.mrb[15].mxu1 }
 0x139   : > { %v3064_v54 = vpop.f32.mrb[16].mxu1 }
 0x13a   : > { %v3066_v55 = vpop.f32.mrb[17].mxu1 }
 0x13d   : > { %v3068_v56 = vpop.f32.mrb[18].mxu1 }
 0x13e   : > { %v3070_v57 = vpop.f32.mrb[19].mxu1 }
 0x141   : > { %v3072_v58 = vpop.f32.mrb[20].mxu1 }
 0x142   : > { %v3074_v59 = vpop.f32.mrb[21].mxu1 }
 0x145   : > { %v3076_v60 = vpop.f32.mrb[22].mxu1 }
 0x146   : > { %v3078_v61 = vpop.f32.mrb[23].mxu1 }
 0x149   : > { %v3080_v62 = vpop.f32.mrb[24].mxu1 }
 0x14a   : > { %v3082_v0 = vpop.f32.mrb[25].mxu1 }
 0x14d   : > { %v3084_v1 = vpop.f32.mrb[26].mxu1 }
 0x14e   : > { %v3086_v3 = vpop.f32.mrb[27].mxu1 }
 0x151   : > { %v3088_v4 = vpop.f32.mrb[28].mxu1 }
 0x152   : > { %v3090_v6 = vpop.f32.mrb[29].mxu1 }
 0x155   : > { %v3095_v10 = vpop.f32.mrb[30].mxu1 }
 0x156   : > { %v3099_v12 = vpop.f32.mrb[31].mxu1 }
 0x166   : > { %v909_v13 = vpop.f32.mrb[0].mxu0 }
 0x167   : > { %v2075_v15 = vadd.f32 %v1070_v38, %v909_v13  ;;  %v911_v16 = vpop.f32.mrb[1].mxu0 }
 0x168   : > { %v2076_v17 = vadd.f32 %v1072_v39, %v911_v16 }
 0x169   : > { %v1276_v18 = vadd.f32 %v2075_v15, %v3097_v11 }
 0x16a   : > { %v1277_v19 = vadd.f32 %v2076_v17, %v3101_v14  ;;  %v915_v20 = vpop.f32.mrb[2].mxu0 }
 0x16b   : > { %v2077_v21 = vadd.f32 %v1076_v40, %v915_v20  ;;  %v917_v22 = vpop.f32.mrb[3].mxu0  ;;  %v1308_v25 = vmax.f32 %v1276_v18, 0.0 }
 0x16c   : > { %v1309_v23 = vmax.f32 %v1277_v19, 0.0  ;;  %v2078_v24 = vadd.f32 %v1078_v41, %v917_v22 }
 0x16d   : > { %v1278_v26 = vadd.f32 %v2077_v21, %v3097_v11 }
 0x16e   : > { %v1279_v27 = vadd.f32 %v2078_v24, %v3101_v14  ;;  %v921_v28 = vpop.f32.mrb[4].mxu0  ;;  %1443 = vmatprep.mubr.f32.mxu1 %v1309_v23 }
 0x16f   : > { %v2079_v29 = vadd.f32 %v1082_v42, %v921_v28  ;;  %v923_v30 = vpop.f32.mrb[5].mxu0  ;;  %1444 = vmatmul.mubr.f32.vlgmr.msra.gmra.mrb[32].mxu1 %v1308_v25  ;;  %v1310_v33 = vmax.f32 %v1278_v26, 0.0 }
 0x170   : > { %v1311_v31 = vmax.f32 %v1279_v27, 0.0  ;;  %v2080_v32 = vadd.f32 %v1084_v43, %v923_v30 }
 0x171   : > { %v1280_v34 = vadd.f32 %v2079_v29, %v3097_v11 }
 0x172   : > { %v1281_v35 = vadd.f32 %v2080_v32, %v3101_v14  ;;  %v927_v36 = vpop.f32.mrb[6].mxu0  ;;  %1448 = vmatprep.mubr.f32.mxu1 %v1311_v31 }
 0x173   : > { %v2081_v37 = vadd.f32 %v1088_v44, %v927_v36  ;;  %v929_v38 = vpop.f32.mrb[7].mxu0  ;;  %1449 = vmatmul.mubr.f32.gmra.mrb[34].mxu1 %v1310_v33  ;;  %v1312_v41 = vmax.f32 %v1280_v34, 0.0 }
 0x174   : > { %v1313_v39 = vmax.f32 %v1281_v35, 0.0  ;;  %v2082_v40 = vadd.f32 %v1090_v45, %v929_v38 }
 0x175   : > { %v1282_v63 = vadd.f32 %v2081_v37, %v3097_v11 }
 0x176   : > { %v1283_v42 = vadd.f32 %v2082_v40, %v3101_v14  ;;  %v933_v2 = vpop.f32.mrb[8].mxu0  ;;  %1453 = vmatprep.mubr.f32.mxu1 %v1313_v39 }
 0x177   : > { %v2083_v43 = vadd.f32 %v3048_v46, %v933_v2  ;;  %v935_v5 = vpop.f32.mrb[9].mxu0  ;;  %1454 = vmatmul.mubr.f32.gmra.mrb[36].mxu1 %v1312_v41  ;;  %v1314_v13 = vmax.f32 %v1282_v63, 0.0 }
 0x178   : > { %v1315_v8 = vmax.f32 %v1283_v42, 0.0  ;;  %v2084_v9 = vadd.f32 %v3050_v47, %v935_v5 }
 0x179   : > { %v1284_v44 = vadd.f32 %v2083_v43, %v3097_v11 }
 0x17a   : > { %v1285_v15 = vadd.f32 %v2084_v9, %v3101_v14  ;;  %v939_v45 = vpop.f32.mrb[10].mxu0  ;;  %1458 = vmatprep.mubr.f32.mxu1 %v1315_v8 }
 0x17b   : > { %v2085_v16 = vadd.f32 %v3052_v48, %v939_v45  ;;  %v941_v17 = vpop.f32.mrb[11].mxu0  ;;  %1459 = vmatmul.mubr.f32.gmra.mrb[38].mxu1 %v1314_v13  ;;  %v1316_v46 = vmax.f32 %v1284_v44, 0.0 }
 0x17c   : > { %v1317_v18 = vmax.f32 %v1285_v15, 0.0  ;;  %v2086_v19 = vadd.f32 %v3054_v49, %v941_v17 }
 0x17d   : > { %v1286_v20 = vadd.f32 %v2085_v16, %v3097_v11 }
 0x17e   : > { %v1287_v21 = vadd.f32 %v2086_v19, %v3101_v14  ;;  %v945_v47 = vpop.f32.mrb[12].mxu0  ;;  %1463 = vmatprep.mubr.f32.mxu1 %v1317_v18 }
 0x17f   : > { %v2087_v22 = vadd.f32 %v3056_v50, %v945_v47  ;;  %v947_v23 = vpop.f32.mrb[13].mxu0  ;;  %1464 = vmatmul.mubr.f32.gmra.mrb[40].mxu1 %v1316_v46  ;;  %v1318_v48 = vmax.f32 %v1286_v20, 0.0 }
 0x180   : > { %v1319_v24 = vmax.f32 %v1287_v21, 0.0  ;;  %v2088_v25 = vadd.f32 %v3058_v51, %v947_v23 }
 0x181   : > { %v1288_v26 = vadd.f32 %v2087_v22, %v3097_v11 }
 0x182   : > { %v1289_v27 = vadd.f32 %v2088_v25, %v3101_v14  ;;  %v951_v49 = vpop.f32.mrb[14].mxu0  ;;  %1468 = vmatprep.mubr.f32.mxu1 %v1319_v24 }
 0x183   : > { %v2089_v28 = vadd.f32 %v3060_v52, %v951_v49  ;;  %v953_v29 = vpop.f32.mrb[15].mxu0  ;;  %1469 = vmatmul.mubr.f32.gmra.mrb[42].mxu1 %v1318_v48  ;;  %v1320_v50 = vmax.f32 %v1288_v26, 0.0 }
 0x184   : > { %v1321_v30 = vmax.f32 %v1289_v27, 0.0  ;;  %v2090_v31 = vadd.f32 %v3062_v53, %v953_v29 }
 0x185   : > { %v1290_v32 = vadd.f32 %v2089_v28, %v3097_v11 }
 0x186   : > { %v1291_v33 = vadd.f32 %v2090_v31, %v3101_v14  ;;  %v957_v51 = vpop.f32.mrb[16].mxu0  ;;  %1473 = vmatprep.mubr.f32.mxu1 %v1321_v30 }
 0x187   : > { %v2091_v34 = vadd.f32 %v3064_v54, %v957_v51  ;;  %v959_v35 = vpop.f32.mrb[17].mxu0  ;;  %1474 = vmatmul.mubr.f32.gmra.mrb[44].mxu1 %v1320_v50  ;;  %v1322_v52 = vmax.f32 %v1290_v32, 0.0 }
 0x188   : > { %v1323_v36 = vmax.f32 %v1291_v33, 0.0  ;;  %v2092_v37 = vadd.f32 %v3066_v55, %v959_v35 }
 0x189   : > { %v1292_v38 = vadd.f32 %v2091_v34, %v3097_v11 }
 0x18a   : > { %v1293_v39 = vadd.f32 %v2092_v37, %v3101_v14  ;;  %v963_v53 = vpop.f32.mrb[18].mxu0  ;;  %1478 = vmatprep.mubr.f32.mxu1 %v1323_v36 }
 0x18b   : > { %v2093_v40 = vadd.f32 %v3068_v56, %v963_v53  ;;  %v965_v41 = vpop.f32.mrb[19].mxu0  ;;  %1479 = vmatmul.mubr.f32.gmra.mrb[46].mxu1 %v1322_v52  ;;  %v1324_v54 = vmax.f32 %v1292_v38, 0.0 }
 0x18c   : > { %v1325_v63 = vmax.f32 %v1293_v39, 0.0  ;;  %v2094_v42 = vadd.f32 %v3070_v57, %v965_v41  ;;  %v2279_v39 = vmov 0.0|0.0  }
 0x18d   : > { %v1294_v2 = vadd.f32 %v2093_v40, %v3097_v11  ;;  %2051 = vmatprep.subr.bf16.mxu1 %v2279_v39 }
 0x18e   : > { %v1295_v43 = vadd.f32 %v2094_v42, %v3101_v14  ;;  %v969_v55 = vpop.f32.mrb[20].mxu0  ;;  %1483 = vmatprep.mubr.f32.mxu1 %v1325_v63 }
 0x18f   : > { %v2095_v5 = vadd.f32 %v3072_v58, %v969_v55  ;;  %v971_v8 = vpop.f32.mrb[21].mxu0  ;;  %1484 = vmatmul.mubr.f32.gmra.mrb[48].mxu1 %v1324_v54  ;;  %v1326_v56 = vmax.f32 %v1294_v2, 0.0 }
 0x190   : > { %v1327_v9 = vmax.f32 %v1295_v43, 0.0  ;;  %v2096_v13 = vadd.f32 %v3074_v59, %v971_v8 }
 0x191   : > { %v1296_v44 = vadd.f32 %v2095_v5, %v3097_v11 }
 0x192   : > { %v1297_v15 = vadd.f32 %v2096_v13, %v3101_v14  ;;  %v975_v57 = vpop.f32.mrb[22].mxu0  ;;  %1488 = vmatprep.mubr.f32.mxu1 %v1327_v9 }
 0x193   : > { %v2097_v45 = vadd.f32 %v3076_v60, %v975_v57  ;;  %v977_v16 = vpop.f32.mrb[23].mxu0  ;;  %1489 = vmatmul.mubr.f32.gmra.mrb[50].mxu1 %v1326_v56  ;;  %v1328_v58 = vmax.f32 %v1296_v44, 0.0 }
 0x194   : > { %v1329_v17 = vmax.f32 %v1297_v15, 0.0  ;;  %v2098_v18 = vadd.f32 %v3078_v61, %v977_v16 }
 0x195   : > { %v1298_v19 = vadd.f32 %v2097_v45, %v3097_v11 }
 0x196   : > { %v1299_v46 = vadd.f32 %v2098_v18, %v3101_v14  ;;  %v981_v59 = vpop.f32.mrb[24].mxu0  ;;  %1493 = vmatprep.mubr.f32.mxu1 %v1329_v17 }
 0x197   : > { %v2099_v20 = vadd.f32 %v3080_v62, %v981_v59  ;;  %v983_v21 = vpop.f32.mrb[25].mxu0  ;;  %1494 = vmatmul.mubr.f32.gmra.mrb[52].mxu1 %v1328_v58  ;;  %v1330_v60 = vmax.f32 %v1298_v19, 0.0 }
 0x198   : > { %v1331_v47 = vmax.f32 %v1299_v46, 0.0  ;;  %v2100_v22 = vadd.f32 %v3082_v0, %v983_v21 }
 0x199   : > { %v1300_v23 = vadd.f32 %v2099_v20, %v3097_v11 }
 0x19a   : > { %v1301_v24 = vadd.f32 %v2100_v22, %v3101_v14  ;;  %v987_v61 = vpop.f32.mrb[26].mxu0  ;;  %1498 = vmatprep.mubr.f32.mxu1 %v1331_v47 }
 0x19b   : > { %v2101_v25 = vadd.f32 %v3084_v1, %v987_v61  ;;  %v989_v48 = vpop.f32.mrb[27].mxu0  ;;  %1499 = vmatmul.mubr.f32.gmra.mrb[54].mxu1 %v1330_v60  ;;  %v1332_v62 = vmax.f32 %v1300_v23, 0.0 }
 0x19c   : > { %v1333_v26 = vmax.f32 %v1301_v24, 0.0  ;;  %v2102_v27 = vadd.f32 %v3086_v3, %v989_v48 }
 0x19d   : > { %v1302_v49 = vadd.f32 %v2101_v25, %v3097_v11 }
 0x19e   : > { %v1303_v28 = vadd.f32 %v2102_v27, %v3101_v14  ;;  %v993_v0 = vpop.f32.mrb[28].mxu0  ;;  %1503 = vmatprep.mubr.f32.mxu1 %v1333_v26 }
 0x19f   : > { %v2103_v29 = vadd.f32 %v3088_v4, %v993_v0  ;;  %v995_v30 = vpop.f32.mrb[29].mxu0  ;;  %1504 = vmatmul.mubr.f32.gmra.mrb[56].mxu1 %v1332_v62  ;;  %v1334_v1 = vmax.f32 %v1302_v49, 0.0 }
 0x1a0   : > { %v1335_v31 = vmax.f32 %v1303_v28, 0.0  ;;  %v2104_v50 = vadd.f32 %v3090_v6, %v995_v30 }
 0x1a1   : > { %v1304_v32 = vadd.f32 %v2103_v29, %v3097_v11 }
 0x1a2   : > { %v1305_v33 = vadd.f32 %v2104_v50, %v3101_v14  ;;  %v999_v3 = vpop.f32.mrb[30].mxu0  ;;  %1508 = vmatprep.mubr.f32.mxu1 %v1335_v31 }
 0x1a3   : > { %v2105_v51 = vadd.f32 %v3095_v10, %v999_v3  ;;  %v1001_v34 = vpop.f32.mrb[31].mxu0  ;;  %1509 = vmatmul.mubr.f32.gmra.mrb[58].mxu1 %v1334_v1  ;;  %v1336_v4 = vmax.f32 %v1304_v32, 0.0 }
 0x1a4   : > { %v1337_v35 = vmax.f32 %v1305_v33, 0.0  ;;  %v2106_v36 = vadd.f32 %v3099_v12, %v1001_v34 }
 0x1a5   : > { %v1306_v37 = vadd.f32 %v2105_v51, %v3097_v11  ;;  %v3164_v11 = vld [vmem:[%s3248_s4] ss:$0 sm:$0xff] }
 0x1a6   : > { %v1307_v52 = vadd.f32 %v2106_v36, %v3101_v14  ;;  %1513 = vmatprep.mubr.f32.mxu1 %v1337_v35 }
 0x1a7   : > { %1514 = vmatmul.mubr.f32.gmra.mrb[60].mxu1 %v1336_v4  ;;  %v1338_v38 = vmax.f32 %v1306_v37, 0.0 }
 0x1a8   : > { %v1339_v6 = vmax.f32 %v1307_v52, 0.0 }
 0x1aa   : > { %1518 = vmatprep.mubr.f32.mxu1 %v1339_v6 }
 0x1ab   : > { %1519 = vmatmul.mubr.f32.gmra.mrb[62].mxu1 %v1338_v38 }
 0x1ac   : > { %1868 = vmatprep.mubr.msk.f32.mxu1 %vm2280_vm1, %v2278_v7 }
 0x242   : > { %v1771_v10 = vpop.f32.mrb[32].mxu1 }
 0x243   : > { %v1772_v53 = vpop.f32.mrb[33].mxu1 }
 0x244   : > { %v1773_v12 = vadd.f32 %v1772_v53, %v1771_v10 }
 0x246   : > { %v1774_v14 = vpop.f32.mrb[34].mxu1  ;;  %v1446_v41 = vadd.f32 %v1773_v12, %v3164_v11 }
 0x247   : > { %v1775_v40 = vpop.f32.mrb[35].mxu1 }
 0x248   : > { %v1776_v63 = vadd.f32 %v1775_v40, %v1774_v14  ;;  %v1524_v43 = vmax.f32 %v1446_v41, 0.0 }
 0x24a   : > { %v1451_v42 = vadd.f32 %v1776_v63, %v3164_v11  ;;  %v1777_v54 = vpop.f32.mrb[36].mxu1 }
 0x24b   : > { %v1778_v2 = vpop.f32.mrb[37].mxu1 }
 0x24c   : > { %v1525_v55 = vmax.f32 %v1451_v42, 0.0  ;;  %v1779_v7 = vadd.f32 %v1778_v2, %v1777_v54 }
 0x24e   : > { %v2052_v5 = vpack.c.bf16 %v1525_v55, %v1524_v43  ;;  %v1780_v8 = vpop.f32.mrb[38].mxu1  ;;  %v1456_v13 = vadd.f32 %v1779_v7, %v3164_v11 }
 0x24f   : > { %v1781_v9 = vpop.f32.mrb[39].mxu1 }
 0x250   : > { %v1782_v56 = vadd.f32 %v1781_v9, %v1780_v8  ;;  %2053 = vmatpush3.bf16.xpose.msra.mxu1 %v2052_v5  ;;  %v1526_v45 = vmax.f32 %v1456_v13, 0.0 }
 0x251   : > { %2054 = vmatprep.subr.bf16.mxu1 %v2279_v39 }
 0x252   : > { %v1461_v44 = vadd.f32 %v1782_v56, %v3164_v11  ;;  %v1783_v15 = vpop.f32.mrb[40].mxu1 }
 0x253   : > { %v1784_v57 = vpop.f32.mrb[41].mxu1 }
 0x254   : > { %v1527_v16 = vmax.f32 %v1461_v44, 0.0  ;;  %v1785_v17 = vadd.f32 %v1784_v57, %v1783_v15 }
 0x256   : > { %v2055_v18 = vpack.c.bf16 %v1527_v16, %v1526_v45  ;;  %v1786_v58 = vpop.f32.mrb[42].mxu1  ;;  %v1466_v46 = vadd.f32 %v1785_v17, %v3164_v11 }
 0x257   : > { %v1787_v19 = vpop.f32.mrb[43].mxu1 }
 0x258   : > { %v1788_v59 = vadd.f32 %v1787_v19, %v1786_v58  ;;  %2056 = vmatpush3.bf16.xpose.msra.mxu1 %v2055_v18  ;;  %v1528_v22 = vmax.f32 %v1466_v46, 0.0  ;;  %v1540_v19 = vld [vmem:[%s3249_s5] sm:$0x1]  ;;  %v1542_v46 = vstv %s1541_s24 }
 0x259   : > { %2057 = vmatprep.subr.bf16.mxu1 %v2279_v39 }
 0x25a   : > { %v1471_v20 = vadd.f32 %v1788_v59, %v3164_v11  ;;  %v1789_v21 = vpop.f32.mrb[44].mxu1 }
 0x25b   : > { %v1790_v47 = vpop.f32.mrb[45].mxu1 }
 0x25c   : > { %v1529_v60 = vmax.f32 %v1471_v20, 0.0  ;;  %v1791_v23 = vadd.f32 %v1790_v47, %v1789_v21 }
 0x25e   : > { %v2058_v24 = vpack.c.bf16 %v1529_v60, %v1528_v22  ;;  %v1792_v61 = vpop.f32.mrb[46].mxu1  ;;  %v1476_v48 = vadd.f32 %v1791_v23, %v3164_v11 }
 0x25f   : > { %v1793_v25 = vpop.f32.mrb[47].mxu1 }
 0x260   : > { %v1794_v26 = vadd.f32 %v1793_v25, %v1792_v61  ;;  %2059 = vmatpush3.bf16.xpose.msra.mxu1 %v2058_v24  ;;  %v1530_v28 = vmax.f32 %v1476_v48, 0.0 }
 0x261   : > { %2060 = vmatprep.subr.bf16.mxu1 %v2279_v39 }
 0x262   : > { %v1481_v27 = vadd.f32 %v1794_v26, %v3164_v11  ;;  %v1795_v62 = vpop.f32.mrb[48].mxu1 }
 0x263   : > { %v1796_v49 = vpop.f32.mrb[49].mxu1 }
 0x264   : > { %v1531_v0 = vmax.f32 %v1481_v27, 0.0  ;;  %v1797_v29 = vadd.f32 %v1796_v49, %v1795_v62 }
 0x266   : > { %v2061_v30 = vpack.c.bf16 %v1531_v0, %v1530_v28  ;;  %v1798_v31 = vpop.f32.mrb[50].mxu1  ;;  %v1486_v1 = vadd.f32 %v1797_v29, %v3164_v11 }
 0x267   : > { %v1799_v50 = vpop.f32.mrb[51].mxu1 }
 0x268   : > { %v1800_v32 = vadd.f32 %v1799_v50, %v1798_v31  ;;  %2062 = vmatpush3.bf16.xpose.msra.mxu1 %v2061_v30  ;;  %v1532_v34 = vmax.f32 %v1486_v1, 0.0 }
 0x269   : > { %2063 = vmatprep.subr.bf16.mxu1 %v2279_v39 }
 0x26a   : > { %v1491_v33 = vadd.f32 %v1800_v32, %v3164_v11  ;;  %v1801_v3 = vpop.f32.mrb[52].mxu1 }
 0x26b   : > { %v1802_v51 = vpop.f32.mrb[53].mxu1 }
 0x26c   : > { %v1533_v35 = vmax.f32 %v1491_v33, 0.0  ;;  %v1803_v36 = vadd.f32 %v1802_v51, %v1801_v3 }
 0x26e   : > { %v2064_v4 = vpack.c.bf16 %v1533_v35, %v1532_v34  ;;  %v1804_v37 = vpop.f32.mrb[54].mxu1  ;;  %v1496_v6 = vadd.f32 %v1803_v36, %v3164_v11 }
 0x26f   : > { %v1805_v52 = vpop.f32.mrb[55].mxu1 }
 0x270   : > { %v1806_v38 = vadd.f32 %v1805_v52, %v1804_v37  ;;  %2065 = vmatpush3.bf16.xpose.msra.mxu1 %v2064_v4  ;;  %v1534_v14 = vmax.f32 %v1496_v6, 0.0 }
 0x271   : > { %2066 = vmatprep.subr.bf16.mxu1 %v2279_v39 }
 0x272   : > { %v1501_v10 = vadd.f32 %v1806_v38, %v3164_v11  ;;  %v1807_v53 = vpop.f32.mrb[56].mxu1 }
 0x273   : > { %v1808_v12 = vpop.f32.mrb[57].mxu1 }
 0x274   : > { %v1535_v40 = vmax.f32 %v1501_v10, 0.0  ;;  %v1809_v41 = vadd.f32 %v1808_v12, %v1807_v53 }
 0x276   : > { %v2067_v63 = vpack.c.bf16 %v1535_v40, %v1534_v14  ;;  %v1810_v42 = vpop.f32.mrb[58].mxu1  ;;  %v1506_v2 = vadd.f32 %v1809_v41, %v3164_v11 }
 0x277   : > { %v1811_v54 = vpop.f32.mrb[59].mxu1 }
 0x278   : > { %v1812_v43 = vadd.f32 %v1811_v54, %v1810_v42  ;;  %2068 = vmatpush3.bf16.xpose.msra.mxu1 %v2067_v63  ;;  %v1536_v8 = vmax.f32 %v1506_v2, 0.0 }
 0x279   : > { %2069 = vmatprep.subr.bf16.mxu1 %v2279_v39 }
 0x27a   : > { %v1511_v55 = vadd.f32 %v1812_v43, %v3164_v11  ;;  %v1813_v7 = vpop.f32.mrb[60].mxu1 }
 0x27b   : > { %v1814_v5 = vpop.f32.mrb[61].mxu1 }
 0x27c   : > { %v1537_v9 = vmax.f32 %v1511_v55, 0.0  ;;  %v1815_v13 = vadd.f32 %v1814_v5, %v1813_v7 }
 0x27e   : > { %v2070_v56 = vpack.c.bf16 %v1537_v9, %v1536_v8  ;;  %v1816_v44 = vpop.f32.mrb[62].mxu1  ;;  %v1516_v57 = vadd.f32 %v1815_v13, %v3164_v11 }
 0x27f   : > { %v1817_v15 = vpop.f32.mrb[63].mxu1 }
 0x280   : > { %v1818_v45 = vadd.f32 %v1817_v15, %v1816_v44  ;;  %2071 = vmatpush3.bf16.xpose.msra.mxu1 %v2070_v56  ;;  %v1538_v17 = vmax.f32 %v1516_v57, 0.0 }
 0x281   : > { %2072 = vmatprep.subr.bf16.mxu1 %v2279_v39 }
 0x282   : > { %v1521_v16 = vadd.f32 %v1818_v45, %v3164_v11 }
 0x284   : > { %v1539_v18 = vmax.f32 %v1521_v16, 0.0 }
 0x286   : > { %v2073_v58 = vpack.c.bf16 %v1539_v18, %v1538_v17 }
 0x288   : > { %2074 = vmatpush3.bf16.xpose.msra.mxu1 %v2073_v58 }
 0x28f   : > { %1869 = vmatmul.mubr.f32.vlgmr.msra.gmra.mrb[64].mxu1 %v1540_v19 }
 0x362   : > { %v1609_v59 = vpop.f32.mrb[64].mxu1 }
 0x363   : > { %v1610_v39 = vadd.f32 %v1609_v59, %v1542_v46  ;;  %v1870_v20 = vpop.f32.mrb[65].mxu1 }
 0x365   : > { %1613 = vst [vmem:[%s315_s6] sm:$0x1] %v1610_v39 }
 0x366   : > { %2211 = shalt.err (!%p2208_p5)
}
 0x367   : > { %s2212_s22 = scalar_lea.hbm %s3197_s25, 16  ;;  %s2216_s24 = scalar_lea.hbm %s3251_s7, 32 }
 0x368   : > { %p2213_p6 = scmp.ne.s32.totalorder %s3197_s25, %s2212_s22  ;;  %p2217_p10 = scmp.lt.u32.totalorder %s3197_s25, %s3251_s7 }
 0x369   : > { %p2218_p11 = scmp.lt.u32.totalorder %s2216_s24, %s2212_s22  ;;  %p2220_p13 = scmp.lt.u32.totalorder %s2212_s22, %s3197_s25 }
 0x36a   : > { %p2214_p7 = pnand %p2213_p6, %p2365_p4 }
 0x36b   : > { %p2219_p12 = por %p2218_p11, %p2217_p10 }
 0x36c   : > { %p2215_p9 = pneg %p2214_p7 }
 0x36d   : > { %p2221_p0 = por %p2220_p13, %p2219_p12 }
 0x36f   : > { %p2222_p1 = pnand %p2221_p0, %p2215_p9 }
 0x371   : > { %2225 = shalt.err (!%p2222_p1)
}
 0x372   : > { %2140 = dma.vmem_to_hbm [thread:$0]  (%p2365_p4), %s3199_s9, 16, %s3197_s25, %s1615_s13  }
 0x373 PF: > { %p2146_p2 = scmp.ge.s32.totalorder %s2276_s8, 2  ;;  %s1639_s11 = sand.u32 1, %s2256_s26  }
 0x374   : > { %s1640_s29 = scalar_lea.sflag [#allocation5], %s1639_s11 }
 0x375   : > { %p2143_p3 = pnand %p2146_p2, %p2372_p8 }
 0x377   : > { %2251 = dma.done.wait (!%p2143_p3), %s1640_s29, 16  }
 0x378   : > { %2253 = vsyncadd (!%p2143_p3), %s1640_s29, 4294967280  ;;  %s21_s8 = sadd.s32 1, %s2276_s8   ;;  %s3254_s26 = smov %s2260_s27 }
 0x379   : > { %p18_p5 = scmp.ge.s32.totalorder %s21_s8, 4   ;;  %s3255_s27 = smov %s2264_s28 }
 0x37a   : > { %s3256_s28 = smov %s2378_s15  ;;  %s3257_s29 = smov %s2272_s30 }
 0x37b   : > { %s3258_s30 = smov %s3260_s10  ;;  %20 = sbr.rel (!%p18_p5) target bundleno = 6 (0x6), region = 94 }
 0x382   :  { %1644 = vsyncpa [#allocation5], 1 }
 0x383   :  { %1646 = vsyncpa [#allocation5 + $0x1], 1 }

</bundles_post_ra>
